<compile_context>
chip_gen: v7x
topology: tpu7x:2x2x1
jax: 0.10.0
libtpu: 0.0.40
codegen_flags: <defaults>
</compile_context>

<pallas_src>
import jax
import jax.numpy as jnp
from jax.experimental import pallas as pl
from jax.experimental.pallas import tpu as pltpu

# ---- small synthetic shapes consistent with the module ----
B = 2             # batch
S = 8             # sequence length
H = 32            # args['hidden_size']
NH = 8            # MultiHeadAttention(8, hidden_size, 64, 64)
DK = 64
DV = 64
DKP = 128         # per-head width padded to one full lane group (128)
NUM_LABELS = 3
VOCAB = 100
LANE = 128        # classifier output padded to a full lane width
MHA_LN_EPS = 1e-6


# ---------------------------------------------------------------------------
# Fused kernel: MHA (+residual +LayerNorm) + sum-over-S + ReLU + classifier
# ---------------------------------------------------------------------------
def _fused_kernel(x_ref, wqkv_ref, wfc_ref, g_ref, b_ref, wl_ref, bl_ref,
                  o_ref, ctx_ref):
    b, s, h = x_ref.shape
    hw = NH * DKP                                                 # 1024

    x2 = x_ref[...].reshape(b * s, h)                             # (B*S, H) f32
    xb = x2.astype(jnp.bfloat16)

    # One fused Q|K|V projection: (16,32) @ (32,3072); single MXU issue.
    qkv = jnp.dot(xb, wqkv_ref[...], preferred_element_type=jnp.float32)
    qkvb = qkv.astype(jnp.bfloat16)                               # single cast pass
    q3 = qkvb[:, 0 * hw:1 * hw].reshape(b, s, hw)                 # 128-aligned slices
    k3 = qkvb[:, 1 * hw:2 * hw].reshape(b, s, hw)
    v3 = qkvb[:, 2 * hw:3 * hw].reshape(b, s, hw)

    # Per-head attention (static unroll of 8).  Head columns are zero-padded
    # 64->128 in the weights, so every slice below is a free 128-aligned view
    # and the padded lanes contribute exact zeros to the contractions.
    # 1/sqrt(d_k) is pre-folded into wq; no mask (slf_attn is called unmasked).
    for hd in range(NH):
        lo = hd * DKP
        qh = q3[:, :, lo:lo + DKP]                                # (B, S, 128)
        kh = k3[:, :, lo:lo + DKP]
        vh = v3[:, :, lo:lo + DKP]
        sc = jnp.einsum('bqd,bkd->bqk', qh, kh,
                        preferred_element_type=jnp.float32)       # (B, S, S) f32
        m = jnp.max(sc, axis=-1, keepdims=True)
        p = jnp.exp(sc - m)
        denom = jnp.sum(p, axis=-1, keepdims=True)
        a = (p * pl.reciprocal(denom, approx=True)).astype(jnp.bfloat16)
        oh = jnp.einsum('bqk,bkd->bqd', a, vh,
                        preferred_element_type=jnp.float32)       # (B, S, 128)
        # 128-aligned, full-vreg store into the context slab (no lane concat).
        ctx_ref[:, lo:lo + DKP] = oh.reshape(b * s, DKP).astype(jnp.bfloat16)

    # Output projection: one K=1024 contraction (padded rows of wfc are zero).
    attn_out = jnp.dot(ctx_ref[...], wfc_ref[...],
                       preferred_element_type=jnp.float32)        # (B*S, H)

    # dropout(fc(.)) + residual (eval) then MHA-internal LayerNorm(eps=1e-6), f32.
    out = attn_out + x2
    mu = jnp.mean(out, axis=-1, keepdims=True)
    var = jnp.mean((out - mu) ** 2, axis=-1, keepdims=True)
    out = (out - mu) * jax.lax.rsqrt(var + MHA_LN_EPS)
    out = out * g_ref[...] + b_ref[...]

    # h_n = embs.sum(1); dropout (eval, identity); ReLU; final Linear.
    h_n = jnp.sum(out.reshape(b, s, h), axis=1)                   # (B, H)
    h_n = jnp.maximum(h_n, 0.0)
    logits = jnp.dot(h_n.astype(jnp.bfloat16), wl_ref[...],
                     preferred_element_type=jnp.float32) + bl_ref[...]
    o_ref[...] = logits.astype(o_ref.dtype)                       # (B, 128) lane-dense


def fused_forward_pallas(embs, params):
    b, s, h = embs.shape
    vmem = pl.BlockSpec(memory_space=pltpu.MemorySpace.VMEM)
    logits_pad = pl.pallas_call(
        _fused_kernel,
        out_shape=jax.ShapeDtypeStruct((b, LANE), jnp.float32),
        in_specs=[vmem] * 7,            # gridless: whole arrays resident in VMEM
        out_specs=vmem,
        scratch_shapes=[pltpu.VMEM((b * s, NH * DKP), jnp.bfloat16)],
    )(embs, params["wqkv"], params["wfc"],
      params["mha_ln_g"], params["mha_ln_b"],
      params["w_lin_pad"], params["b_lin_pad"])
    return logits_pad[:, :NUM_LABELS]


# ---------------------------------------------------------------------------
# (approximate) RoBERTa embedder -- kept in XLA (tiny: 2 KiB of activations)
# ---------------------------------------------------------------------------
def roberta_embed(inputs, mask, tok_emb, pos_emb, ln_g, ln_b):
    # TODO(synk): the pretrained 12-layer RobertaModel encoder cannot be
    # reproduced in-script; this implements only its embedding stage
    # (word + position embedding + LayerNorm).  `mask` is accepted but unused.
    del mask
    x = tok_emb[inputs] + pos_emb[jnp.arange(inputs.shape[1])][None, :, :]
    mu = jnp.mean(x, axis=-1, keepdims=True)
    var = jnp.mean((x - mu) ** 2, axis=-1, keepdims=True)
    return (x - mu) / jnp.sqrt(var + 1e-5) * ln_g + ln_b


# ---------------------------------------------------------------------------
# Full forward (features=None path)
# ---------------------------------------------------------------------------
@jax.jit
def forward(inputs, lens, mask, labels, params):
    del lens, labels  # unused by the torch forward as well
    embs = roberta_embed(inputs, mask, params["tok_emb"], params["pos_emb"],
                         params["emb_ln_g"], params["emb_ln_b"])
    # TODO(synk): `features is not None` branch (concat + PositionalEncoding +
    # outer LayerNorm) not exercised; only the features=None path is implemented.
    return fused_forward_pallas(embs, params)


# ---------------------------------------------------------------------------
# Pure-JAX reference of the fused kernel (same bf16-MXU / f32-accumulate math,
# exact softmax division instead of the approx reciprocal).
# ---------------------------------------------------------------------------
def _mha_classifier_reference(embs, params):
    b, s, h = embs.shape
    hw = NH * DKP
    x2 = embs.reshape(b * s, h).astype(jnp.float32)
    xb = x2.astype(jnp.bfloat16)
    qkv = jnp.dot(xb, params["wqkv"],
                  preferred_element_type=jnp.float32).astype(jnp.bfloat16)
    q = qkv[:, 0 * hw:1 * hw].reshape(b, s, NH, DKP)
    k = qkv[:, 1 * hw:2 * hw].reshape(b, s, NH, DKP)
    v = qkv[:, 2 * hw:3 * hw].reshape(b, s, NH, DKP)
    sc = jnp.einsum('bqhd,bkhd->bhqk', q, k, preferred_element_type=jnp.float32)
    a = jax.nn.softmax(sc, axis=-1)
    oh = jnp.einsum('bhqk,bkhd->bqhd', a.astype(jnp.bfloat16), v,
                    preferred_element_type=jnp.float32)
    ctx = oh.reshape(b * s, NH * DKP).astype(jnp.bfloat16)
    attn_out = jnp.dot(ctx, params["wfc"], preferred_element_type=jnp.float32)
    out = attn_out + x2
    mu = jnp.mean(out, axis=-1, keepdims=True)
    var = jnp.mean((out - mu) ** 2, axis=-1, keepdims=True)
    out = (out - mu) * jax.lax.rsqrt(var + MHA_LN_EPS)
    out = out * params["mha_ln_g"] + params["mha_ln_b"]
    h_n = jnp.maximum(jnp.sum(out.reshape(b, s, h), axis=1), 0.0)
    logits = jnp.dot(h_n.astype(jnp.bfloat16), params["w_lin_pad"],
                     preferred_element_type=jnp.float32) + params["b_lin_pad"]
    return logits[:, :NUM_LABELS]


# ---------------------------------------------------------------------------
# Deterministic parameter init (xavier_normal_, gain('sigmoid') == 1.0)
# ---------------------------------------------------------------------------
def _xavier(key, shape, fan_in, fan_out):
    std = 1.0 * (2.0 / (fan_in + fan_out)) ** 0.5
    return std * jax.random.normal(key, shape, jnp.float32)


def _pad_head_cols(w, d):
    """(H, NH*d) -> (H, NH*DKP): zero-pad each head block d -> 128 columns."""
    w = w.reshape(H, NH, d)
    w = jnp.pad(w, ((0, 0), (0, 0), (0, DKP - d)))
    return w.reshape(H, NH * DKP)


def make_params(key):
    ks = jax.random.split(key, 8)
    # (approximate) RoBERTa embedding tables ('emb' params untouched by reset)
    tok_emb = 0.02 * jax.random.normal(ks[0], (VOCAB, H), jnp.float32)
    pos_emb = 0.02 * jax.random.normal(ks[1], (S, H), jnp.float32)

    # MultiHeadAttention(8, H, 64, 64) — bias-free q/k/v/fc projections, stored
    # transposed, head-padded to 128 lanes and fused into one QKV weight so the
    # kernel does one wide projection matmul and only 128-aligned slices.
    # TODO(synk): torch keeps these Linears in f32; bf16 storage adds ~1e-2
    # level deviation (acceptable for inference, covered by the test tolerance).
    wq = _xavier(ks[2], (H, NH * DK), H, NH * DK) * (DK ** -0.5)  # fold 1/sqrt(dk)
    wk = _xavier(ks[3], (H, NH * DK), H, NH * DK)
    wv = _xavier(ks[4], (H, NH * DV), H, NH * DV)
    wqkv = jnp.concatenate(
        [_pad_head_cols(wq, DK), _pad_head_cols(wk, DK), _pad_head_cols(wv, DV)],
        axis=1).astype(jnp.bfloat16)                              # (32, 3072)

    wfc = _xavier(ks[5], (NH * DV, H), NH * DV, H).reshape(NH, DV, H)
    wfc = jnp.pad(wfc, ((0, 0), (0, DKP - DV), (0, 0)))           # zero padded rows
    wfc = wfc.reshape(NH * DKP, H).astype(jnp.bfloat16)           # (1024, 32)

    # Classifier, padded to 128 output lanes (zeros) for dense stores.
    w_lin = _xavier(ks[6], (H, NUM_LABELS), H, NUM_LABELS)
    w_lin_pad = jnp.zeros((H, LANE), jnp.bfloat16).at[:, :NUM_LABELS].set(
        w_lin.astype(jnp.bfloat16))
    b_lin_pad = jnp.zeros((1, LANE), jnp.float32)

    return {
        "tok_emb": tok_emb,
        "pos_emb": pos_emb,
        "emb_ln_g": jnp.ones((H,), jnp.float32),
        "emb_ln_b": jnp.zeros((H,), jnp.float32),
        "wqkv": wqkv,
        "wfc": wfc,
        "mha_ln_g": jnp.ones((1, H), jnp.float32),
        "mha_ln_b": jnp.zeros((1, H), jnp.float32),
        "w_lin_pad": w_lin_pad,
        "b_lin_pad": b_lin_pad,
    }


if __name__ == "__main__":
    key = jax.random.PRNGKey(0)
    k_in, k_p = jax.random.split(key)
    inputs = jax.random.randint(k_in, (B, S), 0, VOCAB, dtype=jnp.int32)
    lens = jnp.full((B,), S, jnp.int32)
    mask = jnp.ones((B, S), jnp.float32)
    labels = jnp.zeros((B,), jnp.int32)
    params = make_params(k_p)

    logits = forward(inputs, lens, mask, labels, params)
    logits = jax.block_until_ready(logits)

    # Correctness vs pure-JAX reference of the same (bf16-MXU, f32-acc) math.
    embs_ref = roberta_embed(inputs, mask, params["tok_emb"], params["pos_emb"],
                             params["emb_ln_g"], params["emb_ln_b"])
    ref = _mha_classifier_reference(embs_ref, params)

    assert logits.shape == (B, NUM_LABELS), logits.shape
    assert bool(jnp.all(jnp.isfinite(logits)))
    max_err = float(jnp.max(jnp.abs(logits - ref)))
    assert bool(jnp.allclose(logits, ref, atol=2e-2, rtol=2e-2)), max_err
    print("KERNEL_OK")
</pallas_src>

<mosaic_0001>
module attributes {stable_mosaic.version = 11 : i64} {
  func.func @_fused_kernel(%arg0: memref<2x8x32xf32, #tpu.memory_space<vmem>>, %arg1: memref<32x3072xbf16, #tpu.memory_space<vmem>>, %arg2: memref<1024x32xbf16, #tpu.memory_space<vmem>>, %arg3: memref<1x32xf32, #tpu.memory_space<vmem>>, %arg4: memref<1x32xf32, #tpu.memory_space<vmem>>, %arg5: memref<32x128xbf16, #tpu.memory_space<vmem>>, %arg6: memref<1x128xf32, #tpu.memory_space<vmem>>, %arg7: memref<2x128xf32, #tpu.memory_space<vmem>>, %arg8: memref<16x1024xbf16, #tpu.memory_space<vmem>>) attributes {dimension_semantics = [], scalar_prefetch = 0 : i64, scratch_operands = 1 : i64, tpu.core_type = #tpu.core_type<tc>} {
    %c0 = arith.constant 0 : index
    %c0_0 = arith.constant 0 : index
    %c0_1 = arith.constant 0 : index
    %0 = vector.load %arg0[%c0, %c0_0, %c0_1] : memref<2x8x32xf32, #tpu.memory_space<vmem>>, vector<2x8x32xf32>
    %1 = vector.shape_cast %0 : vector<2x8x32xf32> to vector<16x32xf32>
    %2 = arith.truncf %1 : vector<16x32xf32> to vector<16x32xbf16>
    %c0_2 = arith.constant 0 : index
    %c0_3 = arith.constant 0 : index
    %3 = vector.load %arg1[%c0_2, %c0_3] : memref<32x3072xbf16, #tpu.memory_space<vmem>>, vector<32x3072xbf16>
    %cst = arith.constant dense<0.000000e+00> : vector<16x3072xf32>
    %4 = tpu.matmul %2, %3, %cst {dimension_numbers = #tpu.dot_dimension_numbers<[1], [0], [0], [1], [0, 0, 1, 1], [], []>} : vector<16x32xbf16>, vector<32x3072xbf16>, vector<16x3072xf32> -> vector<16x3072xf32>
    %5 = arith.truncf %4 : vector<16x3072xf32> to vector<16x3072xbf16>
    %6 = vector.extract_strided_slice %5 {offsets = [0, 0], sizes = [16, 1024], strides = [1, 1]} : vector<16x3072xbf16> to vector<16x1024xbf16>
    %7 = vector.shape_cast %6 : vector<16x1024xbf16> to vector<2x8x1024xbf16>
    %8 = vector.extract_strided_slice %5 {offsets = [0, 1024], sizes = [16, 1024], strides = [1, 1]} : vector<16x3072xbf16> to vector<16x1024xbf16>
    %9 = vector.shape_cast %8 : vector<16x1024xbf16> to vector<2x8x1024xbf16>
    %10 = vector.extract_strided_slice %5 {offsets = [0, 2048], sizes = [16, 1024], strides = [1, 1]} : vector<16x3072xbf16> to vector<16x1024xbf16>
    %11 = vector.shape_cast %10 : vector<16x1024xbf16> to vector<2x8x1024xbf16>
    %12 = vector.extract_strided_slice %7 {offsets = [0, 0, 0], sizes = [2, 8, 128], strides = [1, 1, 1]} : vector<2x8x1024xbf16> to vector<2x8x128xbf16>
    %13 = vector.extract_strided_slice %9 {offsets = [0, 0, 0], sizes = [2, 8, 128], strides = [1, 1, 1]} : vector<2x8x1024xbf16> to vector<2x8x128xbf16>
    %14 = vector.extract_strided_slice %11 {offsets = [0, 0, 0], sizes = [2, 8, 128], strides = [1, 1, 1]} : vector<2x8x1024xbf16> to vector<2x8x128xbf16>
    "tpu.trace_start"() <{level = 10 : i32, message = "bqd,bkd->bqk"}> : () -> ()
    %cst_4 = arith.constant dense<0.000000e+00> : vector<2x8x8xf32>
    %15 = tpu.matmul %12, %13, %cst_4 {dimension_numbers = #tpu.dot_dimension_numbers<[2], [2], [1], [1], [0, 0, 0, 1, 1, 1], [0], [0]>} : vector<2x8x128xbf16>, vector<2x8x128xbf16>, vector<2x8x8xf32> -> vector<2x8x8xf32>
    "tpu.trace_stop"() : () -> ()
    %cst_5 = arith.constant dense<0xFF800000> : vector<2x8xf32>
    %16 = vector.multi_reduction <maximumf>, %15, %cst_5 [2] : vector<2x8x8xf32> to vector<2x8xf32>
    %17 = vector.shape_cast %16 : vector<2x8xf32> to vector<2x8x1xf32>
    %18 = vector.broadcast %17 : vector<2x8x1xf32> to vector<2x8x8xf32>
    %19 = arith.subf %15, %18 : vector<2x8x8xf32>
    %20 = math.exp %19 : vector<2x8x8xf32>
    %cst_6 = arith.constant dense<0.000000e+00> : vector<2x8xf32>
    %21 = vector.multi_reduction <add>, %20, %cst_6 [2] : vector<2x8x8xf32> to vector<2x8xf32>
    %22 = vector.shape_cast %21 : vector<2x8xf32> to vector<2x8x1xf32>
    %23 = tpu.reciprocal %22 {approx = true} : vector<2x8x1xf32> -> vector<2x8x1xf32>
    %24 = vector.broadcast %23 : vector<2x8x1xf32> to vector<2x8x8xf32>
    %25 = arith.mulf %20, %24 : vector<2x8x8xf32>
    %26 = arith.truncf %25 : vector<2x8x8xf32> to vector<2x8x8xbf16>
    "tpu.trace_start"() <{level = 10 : i32, message = "bqk,bkd->bqd"}> : () -> ()
    %cst_7 = arith.constant dense<0.000000e+00> : vector<2x8x128xf32>
    %27 = tpu.matmul %26, %14, %cst_7 {dimension_numbers = #tpu.dot_dimension_numbers<[2], [1], [1], [2], [0, 0, 0, 1, 1, 2], [0], [0]>} : vector<2x8x8xbf16>, vector<2x8x128xbf16>, vector<2x8x128xf32> -> vector<2x8x128xf32>
    "tpu.trace_stop"() : () -> ()
    %28 = vector.shape_cast %27 : vector<2x8x128xf32> to vector<16x128xf32>
    %29 = arith.truncf %28 : vector<16x128xf32> to vector<16x128xbf16>
    %c0_8 = arith.constant 0 : index
    %c0_9 = arith.constant 0 : index
    %30 = vector.load %arg8[%c0_8, %c0_9] : memref<16x1024xbf16, #tpu.memory_space<vmem>>, vector<16x128xbf16>
    tpu.vector_store %arg8[%c0_8, %c0_9], %29 {strides = array<i32>} : memref<16x1024xbf16, #tpu.memory_space<vmem>>, vector<16x128xbf16>,
    %31 = vector.extract_strided_slice %7 {offsets = [0, 0, 128], sizes = [2, 8, 128], strides = [1, 1, 1]} : vector<2x8x1024xbf16> to vector<2x8x128xbf16>
    %32 = vector.extract_strided_slice %9 {offsets = [0, 0, 128], sizes = [2, 8, 128], strides = [1, 1, 1]} : vector<2x8x1024xbf16> to vector<2x8x128xbf16>
    %33 = vector.extract_strided_slice %11 {offsets = [0, 0, 128], sizes = [2, 8, 128], strides = [1, 1, 1]} : vector<2x8x1024xbf16> to vector<2x8x128xbf16>
    "tpu.trace_start"() <{level = 10 : i32, message = "bqd,bkd->bqk"}> : () -> ()
    %cst_10 = arith.constant dense<0.000000e+00> : vector<2x8x8xf32>
    %34 = tpu.matmul %31, %32, %cst_10 {dimension_numbers = #tpu.dot_dimension_numbers<[2], [2], [1], [1], [0, 0, 0, 1, 1, 1], [0], [0]>} : vector<2x8x128xbf16>, vector<2x8x128xbf16>, vector<2x8x8xf32> -> vector<2x8x8xf32>
    "tpu.trace_stop"() : () -> ()
    %cst_11 = arith.constant dense<0xFF800000> : vector<2x8xf32>
    %35 = vector.multi_reduction <maximumf>, %34, %cst_11 [2] : vector<2x8x8xf32> to vector<2x8xf32>
    %36 = vector.shape_cast %35 : vector<2x8xf32> to vector<2x8x1xf32>
    %37 = vector.broadcast %36 : vector<2x8x1xf32> to vector<2x8x8xf32>
    %38 = arith.subf %34, %37 : vector<2x8x8xf32>
    %39 = math.exp %38 : vector<2x8x8xf32>
    %cst_12 = arith.constant dense<0.000000e+00> : vector<2x8xf32>
    %40 = vector.multi_reduction <add>, %39, %cst_12 [2] : vector<2x8x8xf32> to vector<2x8xf32>
    %41 = vector.shape_cast %40 : vector<2x8xf32> to vector<2x8x1xf32>
    %42 = tpu.reciprocal %41 {approx = true} : vector<2x8x1xf32> -> vector<2x8x1xf32>
    %43 = vector.broadcast %42 : vector<2x8x1xf32> to vector<2x8x8xf32>
    %44 = arith.mulf %39, %43 : vector<2x8x8xf32>
    %45 = arith.truncf %44 : vector<2x8x8xf32> to vector<2x8x8xbf16>
    "tpu.trace_start"() <{level = 10 : i32, message = "bqk,bkd->bqd"}> : () -> ()
    %cst_13 = arith.constant dense<0.000000e+00> : vector<2x8x128xf32>
    %46 = tpu.matmul %45, %33, %cst_13 {dimension_numbers = #tpu.dot_dimension_numbers<[2], [1], [1], [2], [0, 0, 0, 1, 1, 2], [0], [0]>} : vector<2x8x8xbf16>, vector<2x8x128xbf16>, vector<2x8x128xf32> -> vector<2x8x128xf32>
    "tpu.trace_stop"() : () -> ()
    %47 = vector.shape_cast %46 : vector<2x8x128xf32> to vector<16x128xf32>
    %48 = arith.truncf %47 : vector<16x128xf32> to vector<16x128xbf16>
    %c0_14 = arith.constant 0 : index
    %c128 = arith.constant 128 : index
    %49 = vector.load %arg8[%c0_14, %c128] : memref<16x1024xbf16, #tpu.memory_space<vmem>>, vector<16x128xbf16>
    tpu.vector_store %arg8[%c0_14, %c128], %48 {strides = array<i32>} : memref<16x1024xbf16, #tpu.memory_space<vmem>>, vector<16x128xbf16>,
    %50 = vector.extract_strided_slice %7 {offsets = [0, 0, 256], sizes = [2, 8, 128], strides = [1, 1, 1]} : vector<2x8x1024xbf16> to vector<2x8x128xbf16>
    %51 = vector.extract_strided_slice %9 {offsets = [0, 0, 256], sizes = [2, 8, 128], strides = [1, 1, 1]} : vector<2x8x1024xbf16> to vector<2x8x128xbf16>
    %52 = vector.extract_strided_slice %11 {offsets = [0, 0, 256], sizes = [2, 8, 128], strides = [1, 1, 1]} : vector<2x8x1024xbf16> to vector<2x8x128xbf16>
    "tpu.trace_start"() <{level = 10 : i32, message = "bqd,bkd->bqk"}> : () -> ()
    %cst_15 = arith.constant dense<0.000000e+00> : vector<2x8x8xf32>
    %53 = tpu.matmul %50, %51, %cst_15 {dimension_numbers = #tpu.dot_dimension_numbers<[2], [2], [1], [1], [0, 0, 0, 1, 1, 1], [0], [0]>} : vector<2x8x128xbf16>, vector<2x8x128xbf16>, vector<2x8x8xf32> -> vector<2x8x8xf32>
    "tpu.trace_stop"() : () -> ()
    %cst_16 = arith.constant dense<0xFF800000> : vector<2x8xf32>
    %54 = vector.multi_reduction <maximumf>, %53, %cst_16 [2] : vector<2x8x8xf32> to vector<2x8xf32>
    %55 = vector.shape_cast %54 : vector<2x8xf32> to vector<2x8x1xf32>
    %56 = vector.broadcast %55 : vector<2x8x1xf32> to vector<2x8x8xf32>
    %57 = arith.subf %53, %56 : vector<2x8x8xf32>
    %58 = math.exp %57 : vector<2x8x8xf32>
    %cst_17 = arith.constant dense<0.000000e+00> : vector<2x8xf32>
    %59 = vector.multi_reduction <add>, %58, %cst_17 [2] : vector<2x8x8xf32> to vector<2x8xf32>
    %60 = vector.shape_cast %59 : vector<2x8xf32> to vector<2x8x1xf32>
    %61 = tpu.reciprocal %60 {approx = true} : vector<2x8x1xf32> -> vector<2x8x1xf32>
    %62 = vector.broadcast %61 : vector<2x8x1xf32> to vector<2x8x8xf32>
    %63 = arith.mulf %58, %62 : vector<2x8x8xf32>
    %64 = arith.truncf %63 : vector<2x8x8xf32> to vector<2x8x8xbf16>
    "tpu.trace_start"() <{level = 10 : i32, message = "bqk,bkd->bqd"}> : () -> ()
    %cst_18 = arith.constant dense<0.000000e+00> : vector<2x8x128xf32>
    %65 = tpu.matmul %64, %52, %cst_18 {dimension_numbers = #tpu.dot_dimension_numbers<[2], [1], [1], [2], [0, 0, 0, 1, 1, 2], [0], [0]>} : vector<2x8x8xbf16>, vector<2x8x128xbf16>, vector<2x8x128xf32> -> vector<2x8x128xf32>
    "tpu.trace_stop"() : () -> ()
    %66 = vector.shape_cast %65 : vector<2x8x128xf32> to vector<16x128xf32>
    %67 = arith.truncf %66 : vector<16x128xf32> to vector<16x128xbf16>
    %c0_19 = arith.constant 0 : index
    %c256 = arith.constant 256 : index
    %68 = vector.load %arg8[%c0_19, %c256] : memref<16x1024xbf16, #tpu.memory_space<vmem>>, vector<16x128xbf16>
    tpu.vector_store %arg8[%c0_19, %c256], %67 {strides = array<i32>} : memref<16x1024xbf16, #tpu.memory_space<vmem>>, vector<16x128xbf16>,
    %69 = vector.extract_strided_slice %7 {offsets = [0, 0, 384], sizes = [2, 8, 128], strides = [1, 1, 1]} : vector<2x8x1024xbf16> to vector<2x8x128xbf16>
    %70 = vector.extract_strided_slice %9 {offsets = [0, 0, 384], sizes = [2, 8, 128], strides = [1, 1, 1]} : vector<2x8x1024xbf16> to vector<2x8x128xbf16>
    %71 = vector.extract_strided_slice %11 {offsets = [0, 0, 384], sizes = [2, 8, 128], strides = [1, 1, 1]} : vector<2x8x1024xbf16> to vector<2x8x128xbf16>
    "tpu.trace_start"() <{level = 10 : i32, message = "bqd,bkd->bqk"}> : () -> ()
    %cst_20 = arith.constant dense<0.000000e+00> : vector<2x8x8xf32>
    %72 = tpu.matmul %69, %70, %cst_20 {dimension_numbers = #tpu.dot_dimension_numbers<[2], [2], [1], [1], [0, 0, 0, 1, 1, 1], [0], [0]>} : vector<2x8x128xbf16>, vector<2x8x128xbf16>, vector<2x8x8xf32> -> vector<2x8x8xf32>
    "tpu.trace_stop"() : () -> ()
    %cst_21 = arith.constant dense<0xFF800000> : vector<2x8xf32>
    %73 = vector.multi_reduction <maximumf>, %72, %cst_21 [2] : vector<2x8x8xf32> to vector<2x8xf32>
    %74 = vector.shape_cast %73 : vector<2x8xf32> to vector<2x8x1xf32>
    %75 = vector.broadcast %74 : vector<2x8x1xf32> to vector<2x8x8xf32>
    %76 = arith.subf %72, %75 : vector<2x8x8xf32>
    %77 = math.exp %76 : vector<2x8x8xf32>
    %cst_22 = arith.constant dense<0.000000e+00> : vector<2x8xf32>
    %78 = vector.multi_reduction <add>, %77, %cst_22 [2] : vector<2x8x8xf32> to vector<2x8xf32>
    %79 = vector.shape_cast %78 : vector<2x8xf32> to vector<2x8x1xf32>
    %80 = tpu.reciprocal %79 {approx = true} : vector<2x8x1xf32> -> vector<2x8x1xf32>
    %81 = vector.broadcast %80 : vector<2x8x1xf32> to vector<2x8x8xf32>
    %82 = arith.mulf %77, %81 : vector<2x8x8xf32>
    %83 = arith.truncf %82 : vector<2x8x8xf32> to vector<2x8x8xbf16>
    "tpu.trace_start"() <{level = 10 : i32, message = "bqk,bkd->bqd"}> : () -> ()
    %cst_23 = arith.constant dense<0.000000e+00> : vector<2x8x128xf32>
    %84 = tpu.matmul %83, %71, %cst_23 {dimension_numbers = #tpu.dot_dimension_numbers<[2], [1], [1], [2], [0, 0, 0, 1, 1, 2], [0], [0]>} : vector<2x8x8xbf16>, vector<2x8x128xbf16>, vector<2x8x128xf32> -> vector<2x8x128xf32>
    "tpu.trace_stop"() : () -> ()
    %85 = vector.shape_cast %84 : vector<2x8x128xf32> to vector<16x128xf32>
    %86 = arith.truncf %85 : vector<16x128xf32> to vector<16x128xbf16>
    %c0_24 = arith.constant 0 : index
    %c384 = arith.constant 384 : index
    %87 = vector.load %arg8[%c0_24, %c384] : memref<16x1024xbf16, #tpu.memory_space<vmem>>, vector<16x128xbf16>
    tpu.vector_store %arg8[%c0_24, %c384], %86 {strides = array<i32>} : memref<16x1024xbf16, #tpu.memory_space<vmem>>, vector<16x128xbf16>,
    %88 = vector.extract_strided_slice %7 {offsets = [0, 0, 512], sizes = [2, 8, 128], strides = [1, 1, 1]} : vector<2x8x1024xbf16> to vector<2x8x128xbf16>
    %89 = vector.extract_strided_slice %9 {offsets = [0, 0, 512], sizes = [2, 8, 128], strides = [1, 1, 1]} : vector<2x8x1024xbf16> to vector<2x8x128xbf16>
    %90 = vector.extract_strided_slice %11 {offsets = [0, 0, 512], sizes = [2, 8, 128], strides = [1, 1, 1]} : vector<2x8x1024xbf16> to vector<2x8x128xbf16>
    "tpu.trace_start"() <{level = 10 : i32, message = "bqd,bkd->bqk"}> : () -> ()
    %cst_25 = arith.constant dense<0.000000e+00> : vector<2x8x8xf32>
    %91 = tpu.matmul %88, %89, %cst_25 {dimension_numbers = #tpu.dot_dimension_numbers<[2], [2], [1], [1], [0, 0, 0, 1, 1, 1], [0], [0]>} : vector<2x8x128xbf16>, vector<2x8x128xbf16>, vector<2x8x8xf32> -> vector<2x8x8xf32>
    "tpu.trace_stop"() : () -> ()
    %cst_26 = arith.constant dense<0xFF800000> : vector<2x8xf32>
    %92 = vector.multi_reduction <maximumf>, %91, %cst_26 [2] : vector<2x8x8xf32> to vector<2x8xf32>
    %93 = vector.shape_cast %92 : vector<2x8xf32> to vector<2x8x1xf32>
    %94 = vector.broadcast %93 : vector<2x8x1xf32> to vector<2x8x8xf32>
    %95 = arith.subf %91, %94 : vector<2x8x8xf32>
    %96 = math.exp %95 : vector<2x8x8xf32>
    %cst_27 = arith.constant dense<0.000000e+00> : vector<2x8xf32>
    %97 = vector.multi_reduction <add>, %96, %cst_27 [2] : vector<2x8x8xf32> to vector<2x8xf32>
    %98 = vector.shape_cast %97 : vector<2x8xf32> to vector<2x8x1xf32>
    %99 = tpu.reciprocal %98 {approx = true} : vector<2x8x1xf32> -> vector<2x8x1xf32>
    %100 = vector.broadcast %99 : vector<2x8x1xf32> to vector<2x8x8xf32>
    %101 = arith.mulf %96, %100 : vector<2x8x8xf32>
    %102 = arith.truncf %101 : vector<2x8x8xf32> to vector<2x8x8xbf16>
    "tpu.trace_start"() <{level = 10 : i32, message = "bqk,bkd->bqd"}> : () -> ()
    %cst_28 = arith.constant dense<0.000000e+00> : vector<2x8x128xf32>
    %103 = tpu.matmul %102, %90, %cst_28 {dimension_numbers = #tpu.dot_dimension_numbers<[2], [1], [1], [2], [0, 0, 0, 1, 1, 2], [0], [0]>} : vector<2x8x8xbf16>, vector<2x8x128xbf16>, vector<2x8x128xf32> -> vector<2x8x128xf32>
    "tpu.trace_stop"() : () -> ()
    %104 = vector.shape_cast %103 : vector<2x8x128xf32> to vector<16x128xf32>
    %105 = arith.truncf %104 : vector<16x128xf32> to vector<16x128xbf16>
    %c0_29 = arith.constant 0 : index
    %c512 = arith.constant 512 : index
    %106 = vector.load %arg8[%c0_29, %c512] : memref<16x1024xbf16, #tpu.memory_space<vmem>>, vector<16x128xbf16>
    tpu.vector_store %arg8[%c0_29, %c512], %105 {strides = array<i32>} : memref<16x1024xbf16, #tpu.memory_space<vmem>>, vector<16x128xbf16>,
    %107 = vector.extract_strided_slice %7 {offsets = [0, 0, 640], sizes = [2, 8, 128], strides = [1, 1, 1]} : vector<2x8x1024xbf16> to vector<2x8x128xbf16>
    %108 = vector.extract_strided_slice %9 {offsets = [0, 0, 640], sizes = [2, 8, 128], strides = [1, 1, 1]} : vector<2x8x1024xbf16> to vector<2x8x128xbf16>
    %109 = vector.extract_strided_slice %11 {offsets = [0, 0, 640], sizes = [2, 8, 128], strides = [1, 1, 1]} : vector<2x8x1024xbf16> to vector<2x8x128xbf16>
    "tpu.trace_start"() <{level = 10 : i32, message = "bqd,bkd->bqk"}> : () -> ()
    %cst_30 = arith.constant dense<0.000000e+00> : vector<2x8x8xf32>
    %110 = tpu.matmul %107, %108, %cst_30 {dimension_numbers = #tpu.dot_dimension_numbers<[2], [2], [1], [1], [0, 0, 0, 1, 1, 1], [0], [0]>} : vector<2x8x128xbf16>, vector<2x8x128xbf16>, vector<2x8x8xf32> -> vector<2x8x8xf32>
    "tpu.trace_stop"() : () -> ()
    %cst_31 = arith.constant dense<0xFF800000> : vector<2x8xf32>
    %111 = vector.multi_reduction <maximumf>, %110, %cst_31 [2] : vector<2x8x8xf32> to vector<2x8xf32>
    %112 = vector.shape_cast %111 : vector<2x8xf32> to vector<2x8x1xf32>
    %113 = vector.broadcast %112 : vector<2x8x1xf32> to vector<2x8x8xf32>
    %114 = arith.subf %110, %113 : vector<2x8x8xf32>
    %115 = math.exp %114 : vector<2x8x8xf32>
    %cst_32 = arith.constant dense<0.000000e+00> : vector<2x8xf32>
    %116 = vector.multi_reduction <add>, %115, %cst_32 [2] : vector<2x8x8xf32> to vector<2x8xf32>
    %117 = vector.shape_cast %116 : vector<2x8xf32> to vector<2x8x1xf32>
    %118 = tpu.reciprocal %117 {approx = true} : vector<2x8x1xf32> -> vector<2x8x1xf32>
    %119 = vector.broadcast %118 : vector<2x8x1xf32> to vector<2x8x8xf32>
    %120 = arith.mulf %115, %119 : vector<2x8x8xf32>
    %121 = arith.truncf %120 : vector<2x8x8xf32> to vector<2x8x8xbf16>
    "tpu.trace_start"() <{level = 10 : i32, message = "bqk,bkd->bqd"}> : () -> ()
    %cst_33 = arith.constant dense<0.000000e+00> : vector<2x8x128xf32>
    %122 = tpu.matmul %121, %109, %cst_33 {dimension_numbers = #tpu.dot_dimension_numbers<[2], [1], [1], [2], [0, 0, 0, 1, 1, 2], [0], [0]>} : vector<2x8x8xbf16>, vector<2x8x128xbf16>, vector<2x8x128xf32> -> vector<2x8x128xf32>
    "tpu.trace_stop"() : () -> ()
    %123 = vector.shape_cast %122 : vector<2x8x128xf32> to vector<16x128xf32>
    %124 = arith.truncf %123 : vector<16x128xf32> to vector<16x128xbf16>
    %c0_34 = arith.constant 0 : index
    %c640 = arith.constant 640 : index
    %125 = vector.load %arg8[%c0_34, %c640] : memref<16x1024xbf16, #tpu.memory_space<vmem>>, vector<16x128xbf16>
    tpu.vector_store %arg8[%c0_34, %c640], %124 {strides = array<i32>} : memref<16x1024xbf16, #tpu.memory_space<vmem>>, vector<16x128xbf16>,
    %126 = vector.extract_strided_slice %7 {offsets = [0, 0, 768], sizes = [2, 8, 128], strides = [1, 1, 1]} : vector<2x8x1024xbf16> to vector<2x8x128xbf16>
    %127 = vector.extract_strided_slice %9 {offsets = [0, 0, 768], sizes = [2, 8, 128], strides = [1, 1, 1]} : vector<2x8x1024xbf16> to vector<2x8x128xbf16>
    %128 = vector.extract_strided_slice %11 {offsets = [0, 0, 768], sizes = [2, 8, 128], strides = [1, 1, 1]} : vector<2x8x1024xbf16> to vector<2x8x128xbf16>
    "tpu.trace_start"() <{level = 10 : i32, message = "bqd,bkd->bqk"}> : () -> ()
    %cst_35 = arith.constant dense<0.000000e+00> : vector<2x8x8xf32>
    %129 = tpu.matmul %126, %127, %cst_35 {dimension_numbers = #tpu.dot_dimension_numbers<[2], [2], [1], [1], [0, 0, 0, 1, 1, 1], [0], [0]>} : vector<2x8x128xbf16>, vector<2x8x128xbf16>, vector<2x8x8xf32> -> vector<2x8x8xf32>
    "tpu.trace_stop"() : () -> ()
    %cst_36 = arith.constant dense<0xFF800000> : vector<2x8xf32>
    %130 = vector.multi_reduction <maximumf>, %129, %cst_36 [2] : vector<2x8x8xf32> to vector<2x8xf32>
    %131 = vector.shape_cast %130 : vector<2x8xf32> to vector<2x8x1xf32>
    %132 = vector.broadcast %131 : vector<2x8x1xf32> to vector<2x8x8xf32>
    %133 = arith.subf %129, %132 : vector<2x8x8xf32>
    %134 = math.exp %133 : vector<2x8x8xf32>
    %cst_37 = arith.constant dense<0.000000e+00> : vector<2x8xf32>
    %135 = vector.multi_reduction <add>, %134, %cst_37 [2] : vector<2x8x8xf32> to vector<2x8xf32>
    %136 = vector.shape_cast %135 : vector<2x8xf32> to vector<2x8x1xf32>
    %137 = tpu.reciprocal %136 {approx = true} : vector<2x8x1xf32> -> vector<2x8x1xf32>
    %138 = vector.broadcast %137 : vector<2x8x1xf32> to vector<2x8x8xf32>
    %139 = arith.mulf %134, %138 : vector<2x8x8xf32>
    %140 = arith.truncf %139 : vector<2x8x8xf32> to vector<2x8x8xbf16>
    "tpu.trace_start"() <{level = 10 : i32, message = "bqk,bkd->bqd"}> : () -> ()
    %cst_38 = arith.constant dense<0.000000e+00> : vector<2x8x128xf32>
    %141 = tpu.matmul %140, %128, %cst_38 {dimension_numbers = #tpu.dot_dimension_numbers<[2], [1], [1], [2], [0, 0, 0, 1, 1, 2], [0], [0]>} : vector<2x8x8xbf16>, vector<2x8x128xbf16>, vector<2x8x128xf32> -> vector<2x8x128xf32>
    "tpu.trace_stop"() : () -> ()
    %142 = vector.shape_cast %141 : vector<2x8x128xf32> to vector<16x128xf32>
    %143 = arith.truncf %142 : vector<16x128xf32> to vector<16x128xbf16>
    %c0_39 = arith.constant 0 : index
    %c768 = arith.constant 768 : index
    %144 = vector.load %arg8[%c0_39, %c768] : memref<16x1024xbf16, #tpu.memory_space<vmem>>, vector<16x128xbf16>
    tpu.vector_store %arg8[%c0_39, %c768], %143 {strides = array<i32>} : memref<16x1024xbf16, #tpu.memory_space<vmem>>, vector<16x128xbf16>,
    %145 = vector.extract_strided_slice %7 {offsets = [0, 0, 896], sizes = [2, 8, 128], strides = [1, 1, 1]} : vector<2x8x1024xbf16> to vector<2x8x128xbf16>
    %146 = vector.extract_strided_slice %9 {offsets = [0, 0, 896], sizes = [2, 8, 128], strides = [1, 1, 1]} : vector<2x8x1024xbf16> to vector<2x8x128xbf16>
    %147 = vector.extract_strided_slice %11 {offsets = [0, 0, 896], sizes = [2, 8, 128], strides = [1, 1, 1]} : vector<2x8x1024xbf16> to vector<2x8x128xbf16>
    "tpu.trace_start"() <{level = 10 : i32, message = "bqd,bkd->bqk"}> : () -> ()
    %cst_40 = arith.constant dense<0.000000e+00> : vector<2x8x8xf32>
    %148 = tpu.matmul %145, %146, %cst_40 {dimension_numbers = #tpu.dot_dimension_numbers<[2], [2], [1], [1], [0, 0, 0, 1, 1, 1], [0], [0]>} : vector<2x8x128xbf16>, vector<2x8x128xbf16>, vector<2x8x8xf32> -> vector<2x8x8xf32>
    "tpu.trace_stop"() : () -> ()
    %cst_41 = arith.constant dense<0xFF800000> : vector<2x8xf32>
    %149 = vector.multi_reduction <maximumf>, %148, %cst_41 [2] : vector<2x8x8xf32> to vector<2x8xf32>
    %150 = vector.shape_cast %149 : vector<2x8xf32> to vector<2x8x1xf32>
    %151 = vector.broadcast %150 : vector<2x8x1xf32> to vector<2x8x8xf32>
    %152 = arith.subf %148, %151 : vector<2x8x8xf32>
    %153 = math.exp %152 : vector<2x8x8xf32>
    %cst_42 = arith.constant dense<0.000000e+00> : vector<2x8xf32>
    %154 = vector.multi_reduction <add>, %153, %cst_42 [2] : vector<2x8x8xf32> to vector<2x8xf32>
    %155 = vector.shape_cast %154 : vector<2x8xf32> to vector<2x8x1xf32>
    %156 = tpu.reciprocal %155 {approx = true} : vector<2x8x1xf32> -> vector<2x8x1xf32>
    %157 = vector.broadcast %156 : vector<2x8x1xf32> to vector<2x8x8xf32>
    %158 = arith.mulf %153, %157 : vector<2x8x8xf32>
    %159 = arith.truncf %158 : vector<2x8x8xf32> to vector<2x8x8xbf16>
    "tpu.trace_start"() <{level = 10 : i32, message = "bqk,bkd->bqd"}> : () -> ()
    %cst_43 = arith.constant dense<0.000000e+00> : vector<2x8x128xf32>
    %160 = tpu.matmul %159, %147, %cst_43 {dimension_numbers = #tpu.dot_dimension_numbers<[2], [1], [1], [2], [0, 0, 0, 1, 1, 2], [0], [0]>} : vector<2x8x8xbf16>, vector<2x8x128xbf16>, vector<2x8x128xf32> -> vector<2x8x128xf32>
    "tpu.trace_stop"() : () -> ()
    %161 = vector.shape_cast %160 : vector<2x8x128xf32> to vector<16x128xf32>
    %162 = arith.truncf %161 : vector<16x128xf32> to vector<16x128xbf16>
    %c0_44 = arith.constant 0 : index
    %c896 = arith.constant 896 : index
    %163 = vector.load %arg8[%c0_44, %c896] : memref<16x1024xbf16, #tpu.memory_space<vmem>>, vector<16x128xbf16>
    tpu.vector_store %arg8[%c0_44, %c896], %162 {strides = array<i32>} : memref<16x1024xbf16, #tpu.memory_space<vmem>>, vector<16x128xbf16>,
    %c0_45 = arith.constant 0 : index
    %c0_46 = arith.constant 0 : index
    %164 = vector.load %arg8[%c0_45, %c0_46] : memref<16x1024xbf16, #tpu.memory_space<vmem>>, vector<16x1024xbf16>
    %c0_47 = arith.constant 0 : index
    %c0_48 = arith.constant 0 : index
    %165 = vector.load %arg2[%c0_47, %c0_48] : memref<1024x32xbf16, #tpu.memory_space<vmem>>, vector<1024x32xbf16>
    %cst_49 = arith.constant dense<0.000000e+00> : vector<16x32xf32>
    %166 = tpu.matmul %164, %165, %cst_49 {dimension_numbers = #tpu.dot_dimension_numbers<[1], [0], [0], [1], [0, 0, 1, 1], [], []>} : vector<16x1024xbf16>, vector<1024x32xbf16>, vector<16x32xf32> -> vector<16x32xf32>
    %167 = arith.addf %166, %1 : vector<16x32xf32>
    %cst_50 = arith.constant dense<0.000000e+00> : vector<16xf32>
    %168 = vector.multi_reduction <add>, %167, %cst_50 [1] : vector<16x32xf32> to vector<16xf32>
    %169 = vector.shape_cast %168 : vector<16xf32> to vector<16x1xf32>
    %cst_51 = arith.constant 3.200000e+01 : f32
    %170 = vector.broadcast %cst_51 : f32 to vector<16x1xf32>
    %171 = arith.divf %169, %170 : vector<16x1xf32>
    %172 = vector.broadcast %171 : vector<16x1xf32> to vector<16x32xf32>
    %173 = arith.subf %167, %172 : vector<16x32xf32>
    %174 = arith.mulf %173, %173 : vector<16x32xf32>
    %cst_52 = arith.constant dense<0.000000e+00> : vector<16xf32>
    %175 = vector.multi_reduction <add>, %174, %cst_52 [1] : vector<16x32xf32> to vector<16xf32>
    %176 = vector.shape_cast %175 : vector<16xf32> to vector<16x1xf32>
    %cst_53 = arith.constant 3.200000e+01 : f32
    %177 = vector.broadcast %cst_53 : f32 to vector<16x1xf32>
    %178 = arith.divf %176, %177 : vector<16x1xf32>
    %179 = vector.broadcast %171 : vector<16x1xf32> to vector<16x32xf32>
    %180 = arith.subf %167, %179 : vector<16x32xf32>
    %cst_54 = arith.constant 9.99999997E-7 : f32
    %181 = vector.broadcast %cst_54 : f32 to vector<16x1xf32>
    %182 = arith.addf %178, %181 : vector<16x1xf32>
    %183 = math.rsqrt %182 : vector<16x1xf32>
    %184 = vector.broadcast %183 : vector<16x1xf32> to vector<16x32xf32>
    %185 = arith.mulf %180, %184 : vector<16x32xf32>
    %c0_55 = arith.constant 0 : index
    %c0_56 = arith.constant 0 : index
    %186 = vector.load %arg3[%c0_55, %c0_56] : memref<1x32xf32, #tpu.memory_space<vmem>>, vector<1x32xf32>
    %187 = vector.broadcast %186 : vector<1x32xf32> to vector<16x32xf32>
    %188 = arith.mulf %185, %187 : vector<16x32xf32>
    %c0_57 = arith.constant 0 : index
    %c0_58 = arith.constant 0 : index
    %189 = vector.load %arg4[%c0_57, %c0_58] : memref<1x32xf32, #tpu.memory_space<vmem>>, vector<1x32xf32>
    %190 = vector.broadcast %189 : vector<1x32xf32> to vector<16x32xf32>
    %191 = arith.addf %188, %190 : vector<16x32xf32>
    %192 = vector.shape_cast %191 : vector<16x32xf32> to vector<2x8x32xf32>
    %cst_59 = arith.constant dense<0.000000e+00> : vector<2x32xf32>
    %193 = vector.multi_reduction <add>, %192, %cst_59 [1] : vector<2x8x32xf32> to vector<2x32xf32>
    %cst_60 = arith.constant 0.000000e+00 : f32
    %194 = vector.broadcast %cst_60 : f32 to vector<2x32xf32>
    %195 = arith.maximumf %193, %194 : vector<2x32xf32>
    %196 = arith.truncf %195 : vector<2x32xf32> to vector<2x32xbf16>
    %c0_61 = arith.constant 0 : index
    %c0_62 = arith.constant 0 : index
    %197 = vector.load %arg5[%c0_61, %c0_62] : memref<32x128xbf16, #tpu.memory_space<vmem>>, vector<32x128xbf16>
    %cst_63 = arith.constant dense<0.000000e+00> : vector<2x128xf32>
    %198 = tpu.matmul %196, %197, %cst_63 {dimension_numbers = #tpu.dot_dimension_numbers<[1], [0], [0], [1], [0, 0, 1, 1], [], []>} : vector<2x32xbf16>, vector<32x128xbf16>, vector<2x128xf32> -> vector<2x128xf32>
    %c0_64 = arith.constant 0 : index
    %c0_65 = arith.constant 0 : index
    %199 = vector.load %arg6[%c0_64, %c0_65] : memref<1x128xf32, #tpu.memory_space<vmem>>, vector<1x128xf32>
    %200 = vector.broadcast %199 : vector<1x128xf32> to vector<2x128xf32>
    %201 = arith.addf %198, %200 : vector<2x128xf32>
    %c0_66 = arith.constant 0 : index
    %c0_67 = arith.constant 0 : index
    %202 = vector.load %arg7[%c0_66, %c0_67] : memref<2x128xf32, #tpu.memory_space<vmem>>, vector<2x128xf32>
    tpu.vector_store %arg7[%c0_66, %c0_67], %201 {strides = array<i32>} : memref<2x128xf32, #tpu.memory_space<vmem>>, vector<2x128xf32>,
    return
  }
}

</mosaic_0001>

<bundles_post_ra>
// kernel: forward.1
= control target key start
LH: loop header
LB: loop body
LE: loop exit
PB: predicated region body
PF: predicated region fallthrough
CT: control target
= control target key end

     0   :  { %v4149_v6 = vmov 0   ;;  %vm319_vm0 = vcmask 261120   ;;  %s4946_s0 = inlined_call_operand.vmem [shape: f32[2,8,32], index: 0, kind: input, shape index: {}]   ;;  %s4947_s1 = inlined_call_operand.vmem [shape: bf16[32,3072], index: 1, kind: input, shape index: {}]   ;;  %s4948_s2 = inlined_call_operand.vmem [shape: bf16[1024,32], index: 2, kind: input, shape index: {}]   ;;  %s4949_s3 = inlined_call_operand.vmem [shape: f32[1,32], index: 3, kind: input, shape index: {}]   ;;  %s4950_s4 = inlined_call_operand.vmem [shape: f32[1,32], index: 4, kind: input, shape index: {}]   ;;  %s4951_s5 = inlined_call_operand.vmem [shape: bf16[32,128], index: 5, kind: input, shape index: {}]   ;;  %s4952_s6 = inlined_call_operand.vmem [shape: f32[1,128], index: 6, kind: input, shape index: {}]   ;;  %s4953_s7 = inlined_call_operand.hbm [shape: f32[2,128], index: 7, kind: output, shape index: {}]  }
   0x1   :  { %v31_v0 = vld [vmem:[%s4947_s1] sm:$0xff]  ;;  %355 = vmatprep.mubr.bf16.mxu0 %v4149_v6  ;;  %398 = vmatprep.mubr.bf16.mxu1 %v4149_v6  ;;  %v33_v8 = vld [vmem:[%s4947_s1 + $0x10] sm:$0xff]  ;;  %v29_v12 = vld [vmem:[%s4946_s0 + $0x8] sm:$0xff] }
   0x2   :  { %v43_v1 = vld [vmem:[%s4947_s1 + $0x60] sm:$0xff]  ;;  %v45_v9 = vld [vmem:[%s4947_s1 + $0x70] sm:$0xff]  ;;  %v32_v13 = vld [vmem:[%s4947_s1 + $0x8] sm:$0xff] }
   0x3   :  { %v55_v2 = vld [vmem:[%s4947_s1 + $0xc0] sm:$0xff]  ;;  %v3437_v3 = vcombine.high %v31_v0, %v43_v1  ;;  %v3436_v4 = vcombine.low %v31_v0, %v43_v1  ;;  %v3441_v14 = vcombine.high %v33_v8, %v45_v9  ;;  %v44_v15 = vld [vmem:[%s4947_s1 + $0x68] sm:$0xff]  ;;  %v57_v18 = vld [vmem:[%s4947_s1 + $0xd0] sm:$0xff]  ;;  %v3440_v26 = vcombine.low %v33_v8, %v45_v9 }
   0x4   :  { %v67_v5 = vld [vmem:[%s4947_s1 + $0x120] sm:$0xff]  ;;  %v56_v16 = vld [vmem:[%s4947_s1 + $0xc8] sm:$0xff]  ;;  %v69_v19 = vld [vmem:[%s4947_s1 + $0x130] sm:$0xff]  ;;  %v3439_v20 = vcombine.high %v32_v13, %v44_v15  ;;  %v3438_v21 = vcombine.low %v32_v13, %v44_v15 }
   0x5   :  { %v3461_v7 = vcombine.high %v55_v2, %v67_v5  ;;  %323 = vmatprep.subr.bf16.mxu0 %v3437_v3  ;;  %v3460_v10 = vcombine.low %v55_v2, %v67_v5  ;;  %v28_v11 = vld [vmem:[%s4946_s0] sm:$0xff]  ;;  %v68_v17 = vld [vmem:[%s4947_s1 + $0x128] sm:$0xff]  ;;  %v34_v24 = vld [vmem:[%s4947_s1 + $0x18] sm:$0xff]  ;;  %v3465_v27 = vcombine.high %v57_v18, %v69_v19  ;;  %v3464_v34 = vcombine.low %v57_v18, %v69_v19 }
   0x6   :  { %324 = vmatpush1.bf16.msra.mxu0 %v3436_v4  ;;  %v3463_v22 = vcombine.high %v56_v16, %v68_v17  ;;  %v4237_v23 = vpack.c.bf16 %v29_v12, %v28_v11  ;;  %v46_v25 = vld [vmem:[%s4947_s1 + $0x78] sm:$0xff]  ;;  %366 = vmatprep.subr.bf16.mxu1 %v3439_v20  ;;  %v3462_v28 = vcombine.low %v56_v16, %v68_v17  ;;  %v35_v29 = vld [vmem:[%s4947_s1 + $0x20] sm:$0xff]  ;;  %v36_v39 = vld [vmem:[%s4947_s1 + $0x28] sm:$0xff] }
   0x7   :  { %325 = vmatprep.subr.bf16.mxu0 %v3461_v7  ;;  %367 = vmatpush1.bf16.msra.mxu1 %v3438_v21  ;;  %v47_v30 = vld [vmem:[%s4947_s1 + $0x80] sm:$0xff]  ;;  %v3443_v31 = vcombine.high %v34_v24, %v46_v25  ;;  %v58_v32 = vld [vmem:[%s4947_s1 + $0xd8] sm:$0xff]  ;;  %v3442_v38 = vcombine.low %v34_v24, %v46_v25  ;;  %v48_v40 = vld [vmem:[%s4947_s1 + $0x88] sm:$0xff] }
   0x8   :  { %368 = vmatprep.subr.bf16.mxu1 %v3463_v22  ;;  %v70_v33 = vld [vmem:[%s4947_s1 + $0x138] sm:$0xff]  ;;  %v59_v35 = vld [vmem:[%s4947_s1 + $0xe0] sm:$0xff]  ;;  %v3445_v37 = vcombine.high %v35_v29, %v47_v30  ;;  %v3444_v42 = vcombine.low %v35_v29, %v47_v30  ;;  %v37_v43 = vld [vmem:[%s4947_s1 + $0x30] sm:$0xff]  ;;  %v3447_v49 = vcombine.high %v36_v39, %v48_v40  ;;  %v3446_v53 = vcombine.low %v36_v39, %v48_v40 }
   0x9   :  { %v71_v36 = vld [vmem:[%s4947_s1 + $0x140] sm:$0xff]  ;;  %v3467_v41 = vcombine.high %v58_v32, %v70_v33  ;;  %v49_v44 = vld [vmem:[%s4947_s1 + $0x90] sm:$0xff]  ;;  %v3466_v46 = vcombine.low %v58_v32, %v70_v33  ;;  %v60_v47 = vld [vmem:[%s4947_s1 + $0xe8] sm:$0xff] }
   0xa   :  { %326 = vmatpush1.bf16.msra.mxu0 %v3460_v10  ;;  %v3469_v45 = vcombine.high %v59_v35, %v71_v36  ;;  %v72_v48 = vld [vmem:[%s4947_s1 + $0x148] sm:$0xff]  ;;  %v3468_v50 = vcombine.low %v59_v35, %v71_v36  ;;  %v61_v51 = vld [vmem:[%s4947_s1 + $0xf0] sm:$0xff]  ;;  %v3449_v54 = vcombine.high %v37_v43, %v49_v44  ;;  %v38_v55 = vld [vmem:[%s4947_s1 + $0x38] sm:$0xff]  ;;  %v3448_v58 = vcombine.low %v37_v43, %v49_v44 }
   0xb   :  { %409 = vmatprep.subr.bf16.mxu0 %v3441_v14  ;;  %369 = vmatpush1.bf16.msra.mxu1 %v3462_v28  ;;  %v73_v52 = vld [vmem:[%s4947_s1 + $0x150] sm:$0xff]  ;;  %v50_v56 = vld [vmem:[%s4947_s1 + $0x98] sm:$0xff]  ;;  %v3471_v57 = vcombine.high %v60_v47, %v72_v48  ;;  %v39_v59 = vld [vmem:[%s4947_s1 + $0x40] sm:$0xff]  ;;  %v3470_v61 = vcombine.low %v60_v47, %v72_v48 }
   0xc   :  { %452 = vmatprep.subr.bf16.mxu1 %v3443_v31  ;;  %v51_v60 = vld [vmem:[%s4947_s1 + $0xa0] sm:$0xff]  ;;  %v3473_v62 = vcombine.high %v61_v51, %v73_v52  ;;  %v62_v63 = vld [vmem:[%s4947_s1 + $0xf8] sm:$0xff]  ;;  %v3451_v1 = vcombine.high %v38_v55, %v50_v56  ;;  %v3472_v2 = vcombine.low %v61_v51, %v73_v52  ;;  %v3450_v3 = vcombine.low %v38_v55, %v50_v56 }
   0xd   :  { %3484 = vmatmul.mubr.msk.bf16.vlgmr.msra.gmra.mrb[0].mxu0 %vm319_vm0, %v4237_v23  ;;  %v74_v0 = vld [vmem:[%s4947_s1 + $0x158] sm:$0xff]  ;;  %v3453_v4 = vcombine.high %v39_v59, %v51_v60  ;;  %v3452_v7 = vcombine.low %v39_v59, %v51_v60 }
   0xe   :  { %410 = vmatpush1.bf16.msra.mxu0 %v3440_v26  ;;  %441 = vmatprep.mubr.bf16.mxu0 %v4149_v6  ;;  %v3475_v5 = vcombine.high %v62_v63, %v74_v0  ;;  %v3474_v8 = vcombine.low %v62_v63, %v74_v0 }
   0xf   :  { %411 = vmatprep.subr.bf16.mxu0 %v3465_v27  ;;  %3485 = vmatmul.mubr.msk.bf16.vlgmr.msra.gmra.mrb[0].mxu1 %vm319_vm0, %v4237_v23 }
  0x10   :  { %453 = vmatpush1.bf16.msra.mxu1 %v3442_v38  ;;  %484 = vmatprep.mubr.bf16.mxu1 %v4149_v6 }
  0x11   :  { %454 = vmatprep.subr.bf16.mxu1 %v3467_v41 }
  0x12   :  { %412 = vmatpush1.bf16.msra.mxu0 %v3464_v34 }
  0x13   :  { %495 = vmatprep.subr.bf16.mxu0 %v3445_v37 }
  0x14   :  { %455 = vmatpush1.bf16.msra.mxu1 %v3466_v46 }
  0x15   :  { %3486 = vmatmul.mubr.msk.bf16.vlgmr.msra.gmra.mrb[4].mxu0 %vm319_vm0, %v4237_v23  ;;  %538 = vmatprep.subr.bf16.mxu1 %v3447_v49 }
  0x16   :  { %496 = vmatpush1.bf16.msra.mxu0 %v3444_v42  ;;  %527 = vmatprep.mubr.bf16.mxu0 %v4149_v6 }
  0x17   :  { %497 = vmatprep.subr.bf16.mxu0 %v3469_v45  ;;  %3487 = vmatmul.mubr.msk.bf16.vlgmr.msra.gmra.mrb[4].mxu1 %vm319_vm0, %v4237_v23 }
  0x18   :  { %539 = vmatpush1.bf16.msra.mxu1 %v3446_v53  ;;  %570 = vmatprep.mubr.bf16.mxu1 %v4149_v6 }
  0x19   :  { %540 = vmatprep.subr.bf16.mxu1 %v3471_v57 }
  0x1a   :  { %498 = vmatpush1.bf16.msra.mxu0 %v3468_v50 }
  0x1b   :  { %581 = vmatprep.subr.bf16.mxu0 %v3449_v54 }
  0x1c   :  { %541 = vmatpush1.bf16.msra.mxu1 %v3470_v61 }
  0x1d   :  { %3488 = vmatmul.mubr.msk.bf16.vlgmr.msra.gmra.mrb[8].mxu0 %vm319_vm0, %v4237_v23  ;;  %624 = vmatprep.subr.bf16.mxu1 %v3451_v1 }
  0x1e   :  { %582 = vmatpush1.bf16.msra.mxu0 %v3448_v58  ;;  %613 = vmatprep.mubr.bf16.mxu0 %v4149_v6 }
  0x1f   :  { %583 = vmatprep.subr.bf16.mxu0 %v3473_v62  ;;  %3489 = vmatmul.mubr.msk.bf16.vlgmr.msra.gmra.mrb[8].mxu1 %vm319_vm0, %v4237_v23 }
  0x20   :  { %625 = vmatpush1.bf16.msra.mxu1 %v3450_v3  ;;  %656 = vmatprep.mubr.bf16.mxu1 %v4149_v6 }
  0x21   :  { %626 = vmatprep.subr.bf16.mxu1 %v3475_v5 }
  0x22   :  { %584 = vmatpush1.bf16.msra.mxu0 %v3472_v2 }
  0x23   :  { %667 = vmatprep.subr.bf16.mxu0 %v3453_v4 }
  0x24   :  { %627 = vmatpush1.bf16.msra.mxu1 %v3474_v8 }
  0x25   :  { %3490 = vmatmul.mubr.msk.bf16.vlgmr.msra.gmra.mrb[12].mxu0 %vm319_vm0, %v4237_v23 }
  0x26   :  { %668 = vmatpush1.bf16.msra.mxu0 %v3452_v7  ;;  %699 = vmatprep.mubr.bf16.mxu0 %v4149_v6 }
  0x27   :  { %3491 = vmatmul.mubr.msk.bf16.vlgmr.msra.gmra.mrb[12].mxu1 %vm319_vm0, %v4237_v23 }
  0x28   :  { %742 = vmatprep.mubr.bf16.mxu1 %v4149_v6 }
  0x29   :  { %12 = vsyncpa [#allocation4], 0  ;;  %v63_v9 = vld [vmem:[%s4947_s1 + $0x100] sm:$0xff]  ;;  %v40_v11 = vld [vmem:[%s4947_s1 + $0x48] sm:$0xff]  ;;  %v4150_v38 = vmov 0.0   ;;  %vm4151_vm1 = vmmov 0  }
  0x2a   :  { %v75_v10 = vld [vmem:[%s4947_s1 + $0x160] sm:$0xff]  ;;  %v52_v13 = vld [vmem:[%s4947_s1 + $0xa8] sm:$0xff]  ;;  %v41_v21 = vld [vmem:[%s4947_s1 + $0x50] sm:$0xff]  ;;  %vm1083_vm2 = vcmask 1043456   ;;  %vm1055_vm3 = vcmask 64512   ;;  %vm3363_vm4 = vcmask 1041409  }
  0x2b   :  { %v3477_v12 = vcombine.high %v63_v9, %v75_v10  ;;  %v3476_v14 = vcombine.low %v63_v9, %v75_v10  ;;  %v3454_v15 = vcombine.low %v40_v11, %v52_v13  ;;  %v3455_v16 = vcombine.high %v40_v11, %v52_v13  ;;  %v64_v17 = vld [vmem:[%s4947_s1 + $0x108] sm:$0xff]  ;;  %v53_v22 = vld [vmem:[%s4947_s1 + $0xb0] sm:$0xff]  ;;  %v42_v26 = vld [vmem:[%s4947_s1 + $0x58] sm:$0xff]  ;;  %s4152_s25 = smov [#allocation3]  }
  0x2c   :  { %v76_v18 = vld [vmem:[%s4947_s1 + $0x168] sm:$0xff]  ;;  %v3457_v24 = vcombine.high %v41_v21, %v53_v22  ;;  %v3456_v25 = vcombine.low %v41_v21, %v53_v22  ;;  %v54_v27 = vld [vmem:[%s4947_s1 + $0xb8] sm:$0xff]  ;;  %v65_v30 = vld [vmem:[%s4947_s1 + $0x110] sm:$0xff]  ;;  %s3428_s26 = sshll.u32 %s4152_s25, 4  ;;  %s3429_s26 = int_to_ptr.vmem [resolvable:$true] %s3428_s26 }
  0x2d   :  { %669 = vmatprep.subr.bf16.mxu0 %v3477_v12  ;;  %710 = vmatprep.subr.bf16.mxu1 %v3455_v16  ;;  %v3479_v19 = vcombine.high %v64_v17, %v76_v18  ;;  %v3478_v20 = vcombine.low %v64_v17, %v76_v18  ;;  %v3459_v28 = vcombine.high %v42_v26, %v54_v27  ;;  %v77_v31 = vld [vmem:[%s4947_s1 + $0x170] sm:$0xff]  ;;  %v66_v34 = vld [vmem:[%s4947_s1 + $0x118] sm:$0xff]  ;;  %s4125_s27 = scalar_lea.vmem %s3429_s26, 32  ;;  %p4130_p1 = scmp.lt.s32.totalorder %s3429_s26, %s3429_s26 }
  0x2e   :  { %670 = vmatpush1.bf16.msra.mxu0 %v3476_v14  ;;  %711 = vmatpush1.bf16.msra.mxu1 %v3454_v15  ;;  %v3458_v29 = vcombine.low %v42_v26, %v54_v27  ;;  %v3481_v32 = vcombine.high %v65_v30, %v77_v31  ;;  %v3480_v33 = vcombine.low %v65_v30, %v77_v31  ;;  %v78_v35 = vld [vmem:[%s4947_s1 + $0x178] sm:$0xff]  ;;  %p4126_p0 = scmp.ne.s32.totalorder %s3429_s26, %s4125_s27  ;;  %p4131_p2 = scmp.lt.s32.totalorder %s4125_s27, %s4125_s27 }
  0x2f   :  { %712 = vmatprep.subr.bf16.mxu1 %v3479_v19  ;;  %753 = vmatprep.subr.bf16.mxu0 %v3457_v24  ;;  %v3483_v36 = vcombine.high %v66_v34, %v78_v35  ;;  %v3482_v37 = vcombine.low %v66_v34, %v78_v35 }
  0x30   :  { %p4132_p3 = por %p4131_p2, %p4130_p1 }
  0x31   :  { %3492 = vmatmul.mubr.msk.bf16.vlgmr.msra.gmra.mrb[16].mxu0 %vm319_vm0, %v4237_v23 }
  0x32   :  { %785 = vmatprep.mubr.bf16.mxu0 %v4149_v6  ;;  %713 = vmatpush1.bf16.msra.mxu1 %v3478_v20  ;;  %p4133_p4 = pnand %p4132_p3, %p4126_p0 }
  0x33   :  { %754 = vmatpush1.bf16.msra.mxu0 %v3456_v25  ;;  %796 = vmatprep.subr.bf16.mxu1 %v3459_v28 }
  0x34   :  { %755 = vmatprep.subr.bf16.mxu0 %v3481_v32 }
  0x35   :  { %3493 = vmatmul.mubr.msk.bf16.vlgmr.msra.gmra.mrb[16].mxu1 %vm319_vm0, %v4237_v23 }
  0x36   :  { %797 = vmatpush1.bf16.msra.mxu1 %v3458_v29  ;;  %828 = vmatprep.mubr.bf16.mxu1 %v4149_v6 }
  0x37   :  { %756 = vmatpush1.bf16.msra.mxu0 %v3480_v33  ;;  %798 = vmatprep.subr.bf16.mxu1 %v3483_v36 }
  0x38   :  { %3785 = vmatprep.subr.bf16.mxu0 %v4150_v38 }
  0x3a   :  { %799 = vmatpush1.bf16.msra.mxu1 %v3482_v37  ;;  %3494 = vmatmul.mubr.msk.bf16.vlgmr.msra.gmra.mrb[20].mxu0 %vm319_vm0, %v4237_v23 }
  0x3b   :  { %3791 = vmatprep.subr.bf16.mxu1 %v4150_v38  ;;  %3787 = vmatprep.mubr.msk.bf16.mxu0 %vm4151_vm1, %v4150_v38 }
  0x3d   :  { %3495 = vmatmul.mubr.msk.bf16.vlgmr.msra.gmra.mrb[20].mxu1 %vm319_vm0, %v4237_v23 }
  0x3e   :  { %3793 = vmatprep.mubr.msk.bf16.mxu1 %vm4151_vm1, %v4150_v38 }
  0xe0   :  { %v357_v6 = vpop.f32.mrb[0].mxu0 }
  0xe1   :  { %v359_v39 = vpop.f32.mrb[1].mxu0 }
  0xe2   :  { %v4387_v40 = vpack.c.bf16 %v359_v39, %v357_v6  ;;  %v361_v41 = vpop.f32.mrb[2].mxu0  ;;  %v400_v23 = vpop.f32.mrb[0].mxu1 }
  0xe3   :  { %v363_v42 = vpop.f32.mrb[3].mxu0  ;;  %v402_v44 = vpop.f32.mrb[1].mxu1 }
  0xe4   :  { %v4389_v43 = vpack.c.bf16 %v363_v42, %v361_v41  ;;  %v4391_v45 = vpack.c.bf16 %v402_v44, %v400_v23  ;;  %v404_v46 = vpop.f32.mrb[2].mxu1 }
  0xe5   :  { %v406_v48 = vpop.f32.mrb[3].mxu1 }
  0xe6   :  { %v4393_v50 = vpack.c.bf16 %v406_v48, %v404_v46 }
  0xe8   :  { %v443_v47 = vpop.f32.mrb[4].mxu0 }
  0xe9   :  { %v445_v49 = vpop.f32.mrb[5].mxu0 }
  0xea   :  { %v4395_v51 = vpack.c.bf16 %v445_v49, %v443_v47  ;;  %v447_v52 = vpop.f32.mrb[6].mxu0  ;;  %v486_v55 = vpop.f32.mrb[4].mxu1 }
  0xeb   :  { %v449_v53 = vpop.f32.mrb[7].mxu0  ;;  %v488_v56 = vpop.f32.mrb[5].mxu1 }
  0xec   :  { %v4397_v54 = vpack.c.bf16 %v449_v53, %v447_v52  ;;  %v4399_v57 = vpack.c.bf16 %v488_v56, %v486_v55  ;;  %v490_v58 = vpop.f32.mrb[6].mxu1 }
  0xed   :  { %v492_v60 = vpop.f32.mrb[7].mxu1 }
  0xee   :  { %v4401_v62 = vpack.c.bf16 %v492_v60, %v490_v58 }
  0xf0   :  { %v529_v59 = vpop.f32.mrb[8].mxu0 }
  0xf1   :  { %v531_v61 = vpop.f32.mrb[9].mxu0 }
  0xf2   :  { %v4403_v63 = vpack.c.bf16 %v531_v61, %v529_v59  ;;  %v533_v0 = vpop.f32.mrb[10].mxu0  ;;  %v572_v3 = vpop.f32.mrb[8].mxu1 }
  0xf3   :  { %v535_v1 = vpop.f32.mrb[11].mxu0  ;;  %v574_v4 = vpop.f32.mrb[9].mxu1 }
  0xf4   :  { %v4405_v2 = vpack.c.bf16 %v535_v1, %v533_v0  ;;  %3786 = vmatpush3.bf16.xpose.msra.mxu0 %v4403_v63  ;;  %v4410_v5 = vpack.c.bf16 %v574_v4, %v572_v3  ;;  %v576_v7 = vpop.f32.mrb[10].mxu1 }
  0xf5   :  { %3797 = vmatprep.subr.bf16.mxu0 %v4150_v38  ;;  %v578_v8 = vpop.f32.mrb[11].mxu1 }
  0xf6   :  { %3792 = vmatpush3.bf16.xpose.msra.mxu1 %v4405_v2  ;;  %v4413_v10 = vpack.c.bf16 %v578_v8, %v576_v7 }
  0xf7   :  { %3803 = vmatprep.subr.bf16.mxu1 %v4150_v38 }
  0xf8   :  { %v615_v9 = vpop.f32.mrb[12].mxu0 }
  0xf9   :  { %v617_v11 = vpop.f32.mrb[13].mxu0 }
  0xfa   :  { %v4415_v12 = vpack.c.bf16 %v617_v11, %v615_v9  ;;  %v619_v13 = vpop.f32.mrb[14].mxu0  ;;  %v658_v16 = vpop.f32.mrb[12].mxu1 }
  0xfb   :  { %3788 = vmatmul.mubr.bf16.vlgmr.msra.gmra.mrb[24].mxu0 %v4387_v40  ;;  %v621_v14 = vpop.f32.mrb[15].mxu0  ;;  %v660_v17 = vpop.f32.mrb[13].mxu1 }
  0xfc   :  { %v4418_v15 = vpack.c.bf16 %v621_v14, %v619_v13  ;;  %3799 = vmatprep.mubr.msk.bf16.mxu0 %vm4151_vm1, %v4150_v38  ;;  %v4425_v18 = vpack.c.bf16 %v660_v17, %v658_v16  ;;  %v662_v19 = vpop.f32.mrb[14].mxu1 }
  0xfd   :  { %3794 = vmatmul.mubr.bf16.vlgmr.msra.gmra.mrb[24].mxu1 %v4389_v43  ;;  %v664_v20 = vpop.f32.mrb[15].mxu1 }
  0xfe   :  { %3805 = vmatprep.mubr.msk.bf16.mxu1 %vm4151_vm1, %v4150_v38  ;;  %v4427_v21 = vpack.c.bf16 %v664_v20, %v662_v19 }
 0x104   :  { %v701_v22 = vpop.f32.mrb[16].mxu0 }
 0x105   :  { %v703_v24 = vpop.f32.mrb[17].mxu0 }
 0x106   :  { %v3622_v25 = vpack.c.bf16 %v703_v24, %v701_v22  ;;  %v705_v26 = vpop.f32.mrb[18].mxu0 }
 0x107   :  { %v707_v27 = vpop.f32.mrb[19].mxu0 }
 0x108   :  { %v1085_v28 = vsel %vm1083_vm2, %v3622_v25, 0  ;;  %v3626_v29 = vpack.c.bf16 %v707_v27, %v705_v26  ;;  %v1287_v30 = vrot.slane %v3622_v25, 4  ;;  %v744_v31 = vpop.f32.mrb[16].mxu1 }
 0x109   :  { %3798 = vmatpush3.bf16.msra.mxu0 %v1085_v28  ;;  %v746_v34 = vpop.f32.mrb[17].mxu1 }
 0x10a   :  { %v1131_v32 = vsel %vm1083_vm2, %v3626_v29, 0  ;;  %v1334_v33 = vrot.slane %v3626_v29, 4  ;;  %3809 = vmatprep.subr.bf16.mxu0 %v4150_v38  ;;  %v3623_v35 = vpack.c.bf16 %v746_v34, %v744_v31  ;;  %v748_v36 = vpop.f32.mrb[18].mxu1  ;;  %v4437_v42 = vsel %vm1083_vm2, %v1287_v30, 0 }
 0x10b   :  { %3804 = vmatpush3.bf16.msra.mxu1 %v1131_v32  ;;  %v750_v37 = vpop.f32.mrb[19].mxu1 }
 0x10c   :  { %3815 = vmatprep.subr.bf16.mxu1 %v4150_v38  ;;  %v4434_v6 = vsel %vm1083_vm2, %v3623_v35, 0  ;;  %v1693_v39 = vrot.slane %v3623_v35, 4  ;;  %v3627_v41 = vpack.c.bf16 %v750_v37, %v748_v36  ;;  %v4440_v44 = vsel %vm1083_vm2, %v1334_v33, 0 }
 0x10d   :  { %v787_v23 = vpop.f32.mrb[20].mxu0 }
 0x10e   :  { %v4443_v46 = vsel %vm1083_vm2, %v3627_v41, 0  ;;  %v1740_v47 = vrot.slane %v3627_v41, 4  ;;  %v789_v48 = vpop.f32.mrb[21].mxu0  ;;  %v4446_v56 = vsel %vm1083_vm2, %v1693_v39, 0 }
 0x10f   :  { %v3624_v49 = vpack.c.bf16 %v789_v48, %v787_v23  ;;  %v791_v52 = vpop.f32.mrb[22].mxu0 }
 0x110   :  { %v793_v53 = vpop.f32.mrb[23].mxu0  ;;  %v830_v55 = vpop.f32.mrb[20].mxu1  ;;  %v4449_v58 = vsel %vm1083_vm2, %v1740_v47, 0 }
 0x111   :  { %v4452_v59 = vsel %vm1083_vm2, %v3624_v49, 0  ;;  %v3628_v60 = vpack.c.bf16 %v793_v53, %v791_v52  ;;  %v832_v61 = vpop.f32.mrb[21].mxu1  ;;  %v2099_v7 = vrot.slane %v3624_v49, 4 }
 0x112   :  { %v3625_v0 = vpack.c.bf16 %v832_v61, %v830_v55  ;;  %v834_v1 = vpop.f32.mrb[22].mxu1 }
 0x113   :  { %v4455_v3 = vsel %vm1083_vm2, %v3628_v60, 0  ;;  %v836_v4 = vpop.f32.mrb[23].mxu1  ;;  %v2146_v8 = vrot.slane %v3628_v60, 4  ;;  %v4464_v17 = vsel %vm1083_vm2, %v2099_v7, 0 }
 0x114   :  { %v4458_v9 = vsel %vm1083_vm2, %v3625_v0, 0  ;;  %v3629_v11 = vpack.c.bf16 %v836_v4, %v834_v1  ;;  %v2505_v14 = vrot.slane %v3625_v0, 4  ;;  %v1177_v1 = vrot.slane %v4403_v63, 4 }
 0x115   :  { %v4467_v19 = vsel %vm1083_vm2, %v2146_v8, 0  ;;  %v1221_v8 = vrot.slane %v4405_v2, 4  ;;  %v1175_v63 = vrot.slane %v4387_v40, 4 }
 0x116   :  { %v4461_v13 = vsel %vm1083_vm2, %v3629_v11, 0  ;;  %v2552_v16 = vrot.slane %v3629_v11, 4  ;;  %v4470_v20 = vsel %vm1083_vm2, %v2505_v14, 0  ;;  %v1219_v11 = vrot.slane %v4389_v43, 4 }
 0x118   :  { %v4473_v22 = vsel %vm1083_vm2, %v2552_v16, 0 }
 0x1ce   :  { %v1009_v24 = vpop.f32.mrb[24].mxu0 }
 0x1cf   :  { %v3789_v25 = vpop.f32.mrb[25].mxu0  ;;  %v1056_v26 = vsel %vm1055_vm3, %v1009_v24, -inf }
 0x1d0   :  { %v1049_v27 = vpop.f32.mrb[24].mxu1  ;;  %1057 = vmax.xlane.f32.xlu0 %v1056_v26  ;;  %v1012_v28 = vpop.f32.mrb[26].mxu0 }
 0x1d1   :  { %v3790_v29 = vpop.f32.mrb[27].mxu0  ;;  %v3795_v30 = vpop.f32.mrb[25].mxu1  ;;  %v1059_v33 = vsel %vm1055_vm3, %v1049_v27, -inf }
 0x1d2   :  { %v1052_v31 = vpop.f32.mrb[26].mxu1 }
 0x1d3   :  { %v3796_v32 = vpop.f32.mrb[27].mxu1 }
 0x1d4   :  { %1060 = vmax.xlane.f32.xlu0 %v1059_v33 }
 0x25d   :  { %v1058_v34 = vpop.xlane.xlu0 %1057 }
 0x25e   :  { %v1062_v35 = vsub.f32 %v1009_v24, %v1058_v34 }
 0x260   :  { %v1064_v36 = vmul.f32 1.442695, %v1062_v35 }
 0x261   :  { %v1061_v37 = vpop.xlane.xlu0 %1060 }
 0x262   :  { %4055 = vpow2.f32 %v1064_v36  ;;  %v1063_v39 = vsub.f32 %v1049_v27, %v1061_v37 }
 0x264   :  { %v1066_v41 = vmul.f32 1.442695, %v1063_v39 }
 0x266   :  { %4057 = vpow2.f32 %v1066_v41 }
 0x26c   :  { %v4056_v23 = vpop.eup %4055 }
 0x26d   :  { %v1068_v47 = vsel %vm1055_vm3, %v4056_v23, 0.0 }
 0x26e   :  { %1069 = vadd.xlane.f32.xlu1 %v1068_v47 }
 0x270   :  { %v4058_v48 = vpop.eup %4057 }
 0x271   :  { %v1071_v49 = vsel %vm1055_vm3, %v4058_v48, 0.0 }
 0x272   :  { %1072 = vadd.xlane.f32.xlu1 %v1071_v49 }
 0x2fb   :  { %v1070_v52 = vpop.xlane.xlu1 %1069 }
 0x2fc   :  { %4059 = vrcp.f32 %v1070_v52 }
 0x2ff   :  { %v1073_v53 = vpop.xlane.xlu1 %1072 }
 0x300   :  { %4061 = vrcp.f32 %v1073_v53 }
 0x306   :  { %v4060_v55 = vpop.eup %4059 }
 0x307   :  { %v1076_v60 = vmul.f32 %v4060_v55, %v4056_v23 }
 0x309   :  { %v1078_v61 = vpack.c.bf16 %v1076_v60, %v1076_v60 }
 0x30a   :  { %v4062_v0 = vpop.eup %4061 }
 0x30b   :  { %v1077_v4 = vmul.f32 %v4062_v0, %v4058_v48  ;;  %3800 = vmatmul.mubr.msk.bf16.vlgmr.msra.gmra.mrb[28].mxu0 %vm1055_vm3, %v1078_v61 }
 0x30c   :  { %3810 = vmatpush3.bf16.xpose.msra.mxu0 %v1177_v1  ;;  %3811 = vmatprep.mubr.msk.bf16.mxu0 %vm4151_vm1, %v4150_v38 }
 0x30d   :  { %v1079_v7 = vpack.c.bf16 %v1077_v4, %v1077_v4  ;;  %3821 = vmatprep.subr.bf16.mxu0 %v4150_v38 }
 0x30f   :  { %3806 = vmatmul.mubr.msk.bf16.vlgmr.msra.gmra.mrb[28].mxu1 %vm1055_vm3, %v1079_v7 }
 0x310   :  { %3816 = vmatpush3.bf16.xpose.msra.mxu1 %v1221_v8  ;;  %3817 = vmatprep.mubr.msk.bf16.mxu1 %vm4151_vm1, %v4150_v38 }
 0x311   :  { %3827 = vmatprep.subr.bf16.mxu1 %v4150_v38 }
 0x313   :  { %3812 = vmatmul.mubr.bf16.vlgmr.msra.gmra.mrb[32].mxu0 %v1175_v63 }
 0x314   :  { %3822 = vmatpush3.bf16.msra.mxu0 %v4437_v42  ;;  %3823 = vmatprep.mubr.msk.bf16.mxu0 %vm4151_vm1, %v4150_v38 }
 0x315   :  { %3833 = vmatprep.subr.bf16.mxu0 %v4150_v38 }
 0x317   :  { %3818 = vmatmul.mubr.bf16.vlgmr.msra.gmra.mrb[32].mxu1 %v1219_v11 }
 0x318   :  { %3828 = vmatpush3.bf16.msra.mxu1 %v4440_v44  ;;  %3829 = vmatprep.mubr.msk.bf16.mxu1 %vm4151_vm1, %v4150_v38 }
 0x319   :  { %3839 = vmatprep.subr.bf16.mxu1 %v4150_v38 }
 0x3de   :  { %v4499_v40 = vpop.f32.mrb[28].mxu0 }
 0x3df   :  { %v3801_v2 = vpop.f32.mrb[29].mxu0 }
 0x3e0   :  { %v1124_v14 = vpop.f32.mrb[30].mxu0 }
 0x3e1   :  { %v3802_v42 = vpop.f32.mrb[31].mxu0 }
 0x3e2   :  { %v4501_v16 = vpop.f32.mrb[28].mxu1 }
 0x3e3   :  { %v1173_v43 = vpack.c.bf16 %v4501_v16, %v4499_v40  ;;  %v3807_v24 = vpop.f32.mrb[29].mxu1  ;;  %v4025_v40 = vld [vmem:[%s4948_s2 + $0x150] sm:$0xff]   ;;  %v4039_v16 = vld [vmem:[%s4948_s2 + $0x1c8] sm:$0xff]  }
 0x3e4   :  { %v1170_v25 = vpop.f32.mrb[30].mxu1 }
 0x3e5   :  { %v3808_v26 = vpop.f32.mrb[31].mxu1 }
 0x3e6   :  { %v1213_v27 = vpop.f32.mrb[32].mxu0 }
 0x3e7   :  { %v3813_v44 = vpop.f32.mrb[33].mxu0  ;;  %v1263_v28 = vsel %vm1055_vm3, %v1213_v27, -inf }
 0x3e8   :  { %1264 = vmax.xlane.f32.xlu0 %v1263_v28  ;;  %v1216_v29 = vpop.f32.mrb[34].mxu0 }
 0x3e9   :  { %v3814_v30 = vpop.f32.mrb[35].mxu0 }
 0x3ea   :  { %v1257_v31 = vpop.f32.mrb[32].mxu1 }
 0x3eb   :  { %v3819_v32 = vpop.f32.mrb[33].mxu1  ;;  %v1266_v33 = vsel %vm1055_vm3, %v1257_v31, -inf }
 0x3ec   :  { %1267 = vmax.xlane.f32.xlu1 %v1266_v33  ;;  %v1260_v34 = vpop.f32.mrb[34].mxu1 }
 0x3ed   :  { %v3820_v35 = vpop.f32.mrb[35].mxu1 }
 0x475   :  { %v1265_v36 = vpop.xlane.xlu0 %1264 }
 0x476   :  { %v1269_v37 = vsub.f32 %v1213_v27, %v1265_v36 }
 0x478   :  { %v1271_v39 = vmul.f32 1.442695, %v1269_v37 }
 0x479   :  { %v1268_v41 = vpop.xlane.xlu1 %1267 }
 0x47a   :  { %4063 = vpow2.f32 %v1271_v39  ;;  %v1270_v23 = vsub.f32 %v1257_v31, %v1268_v41 }
 0x47c   :  { %v1273_v47 = vmul.f32 1.442695, %v1270_v23 }
 0x47e   :  { %4065 = vpow2.f32 %v1273_v47 }
 0x484   :  { %v4064_v48 = vpop.eup %4063 }
 0x485   :  { %v1275_v49 = vsel %vm1055_vm3, %v4064_v48, 0.0 }
 0x486   :  { %1276 = vadd.xlane.f32.xlu0 %v1275_v49 }
 0x488   :  { %v4066_v52 = vpop.eup %4065 }
 0x489   :  { %v1278_v53 = vsel %vm1055_vm3, %v4066_v52, 0.0 }
 0x48a   :  { %1279 = vadd.xlane.f32.xlu1 %v1278_v53 }
 0x513   :  { %v1277_v55 = vpop.xlane.xlu0 %1276 }
 0x514   :  { %4067 = vrcp.f32 %v1277_v55 }
 0x517   :  { %v1280_v60 = vpop.xlane.xlu1 %1279 }
 0x518   :  { %4069 = vrcp.f32 %v1280_v60 }
 0x51e   :  { %v4068_v61 = vpop.eup %4067 }
 0x51f   :  { %v1283_v0 = vmul.f32 %v4068_v61, %v4064_v48 }
 0x521   :  { %v1285_v1 = vpack.c.bf16 %v1283_v0, %v1283_v0 }
 0x522   :  { %v4070_v4 = vpop.eup %4069 }
 0x523   :  { %v1284_v7 = vmul.f32 %v4070_v4, %v4066_v52  ;;  %3824 = vmatmul.mubr.msk.bf16.vlgmr.msra.gmra.mrb[36].mxu0 %vm1055_vm3, %v1285_v1  ;;  %v1583_v4 = vrot.slane %v4410_v5, 4 }
 0x524   :  { %3834 = vmatpush3.bf16.xpose.msra.mxu0 %v4410_v5  ;;  %3835 = vmatprep.mubr.msk.bf16.mxu0 %vm4151_vm1, %v4150_v38  ;;  %v1581_v5 = vrot.slane %v4391_v45, 4 }
 0x525   :  { %v1286_v8 = vpack.c.bf16 %v1284_v7, %v1284_v7  ;;  %3845 = vmatprep.subr.bf16.mxu0 %v4150_v38 }
 0x527   :  { %3830 = vmatmul.mubr.msk.bf16.vlgmr.msra.gmra.mrb[36].mxu1 %vm1055_vm3, %v1286_v8 }
 0x528   :  { %3840 = vmatpush3.bf16.xpose.msra.mxu1 %v4413_v10  ;;  %3841 = vmatprep.mubr.msk.bf16.mxu1 %vm4151_vm1, %v4150_v38 }
 0x529   :  { %3851 = vmatprep.subr.bf16.mxu1 %v4150_v38 }
 0x52b   :  { %3836 = vmatmul.mubr.bf16.vlgmr.msra.gmra.mrb[40].mxu0 %v4391_v45 }
 0x52c   :  { %3846 = vmatpush3.bf16.msra.mxu0 %v4434_v6  ;;  %3847 = vmatprep.mubr.msk.bf16.mxu0 %vm4151_vm1, %v4150_v38 }
 0x52d   :  { %3857 = vmatprep.subr.bf16.mxu0 %v4150_v38 }
 0x52f   :  { %3842 = vmatmul.mubr.bf16.vlgmr.msra.gmra.mrb[40].mxu1 %v4393_v50 }
 0x530   :  { %3852 = vmatpush3.bf16.msra.mxu1 %v4443_v46  ;;  %3853 = vmatprep.mubr.msk.bf16.mxu1 %vm4151_vm1, %v4150_v38 }
 0x531   :  { %3863 = vmatprep.subr.bf16.mxu1 %v4150_v38 }
 0x5f6   :  { %v4529_v63 = vpop.f32.mrb[36].mxu0 }
 0x5f7   :  { %v3825_v11 = vpop.f32.mrb[37].mxu0 }
 0x5f8   :  { %v1331_v2 = vpop.f32.mrb[38].mxu0  ;;  %v1627_v11 = vrot.slane %v4413_v10, 4 }
 0x5f9   :  { %v3826_v14 = vpop.f32.mrb[39].mxu0  ;;  %v1625_v2 = vrot.slane %v4393_v50, 4 }
 0x5fa   :  { %v4531_v6 = vpop.f32.mrb[36].mxu1 }
 0x5fb   :  { %v1381_v42 = vpack.c.bf16 %v4531_v6, %v4529_v63  ;;  %v3831_v24 = vpop.f32.mrb[37].mxu1  ;;  %v3997_v63 = vld [vmem:[%s4948_s2 + $0x10] sm:$0xff]   ;;  %v3998_v6 = vld [vmem:[%s4948_s2 + $0x88] sm:$0xff]  }
 0x5fc   :  { %v1378_v25 = vpop.f32.mrb[38].mxu1 }
 0x5fd   :  { %v3832_v26 = vpop.f32.mrb[39].mxu1 }
 0x5fe   :  { %v1417_v27 = vpop.f32.mrb[40].mxu0 }
 0x5ff   :  { %v3837_v46 = vpop.f32.mrb[41].mxu0  ;;  %v1463_v44 = vsel %vm1055_vm3, %v1417_v27, -inf }
 0x600   :  { %1464 = vmax.xlane.f32.xlu0 %v1463_v44  ;;  %v1420_v28 = vpop.f32.mrb[42].mxu0 }
 0x601   :  { %v3838_v29 = vpop.f32.mrb[43].mxu0 }
 0x602   :  { %v1457_v30 = vpop.f32.mrb[40].mxu1 }
 0x603   :  { %v3843_v31 = vpop.f32.mrb[41].mxu1  ;;  %v1466_v32 = vsel %vm1055_vm3, %v1457_v30, -inf }
 0x604   :  { %1467 = vmax.xlane.f32.xlu1 %v1466_v32  ;;  %v1460_v33 = vpop.f32.mrb[42].mxu1 }
 0x605   :  { %v3844_v34 = vpop.f32.mrb[43].mxu1 }
 0x68d   :  { %v1465_v35 = vpop.xlane.xlu0 %1464 }
 0x68e   :  { %v1469_v36 = vsub.f32 %v1417_v27, %v1465_v35 }
 0x690   :  { %v1471_v37 = vmul.f32 1.442695, %v1469_v36 }
 0x691   :  { %v1468_v39 = vpop.xlane.xlu1 %1467 }
 0x692   :  { %4071 = vpow2.f32 %v1471_v37  ;;  %v1470_v41 = vsub.f32 %v1457_v30, %v1468_v39 }
 0x694   :  { %v1473_v23 = vmul.f32 1.442695, %v1470_v41 }
 0x696   :  { %4073 = vpow2.f32 %v1473_v23 }
 0x69c   :  { %v4072_v47 = vpop.eup %4071 }
 0x69d   :  { %v1475_v48 = vsel %vm1055_vm3, %v4072_v47, 0.0 }
 0x69e   :  { %1476 = vadd.xlane.f32.xlu0 %v1475_v48 }
 0x6a0   :  { %v4074_v49 = vpop.eup %4073 }
 0x6a1   :  { %v1478_v52 = vsel %vm1055_vm3, %v4074_v49, 0.0 }
 0x6a2   :  { %1479 = vadd.xlane.f32.xlu1 %v1478_v52 }
 0x72b   :  { %v1477_v53 = vpop.xlane.xlu0 %1476 }
 0x72c   :  { %4075 = vrcp.f32 %v1477_v53 }
 0x72f   :  { %v1480_v55 = vpop.xlane.xlu1 %1479 }
 0x730   :  { %4077 = vrcp.f32 %v1480_v55 }
 0x736   :  { %v4076_v60 = vpop.eup %4075 }
 0x737   :  { %v1483_v61 = vmul.f32 %v4076_v60, %v4072_v47 }
 0x739   :  { %v1485_v0 = vpack.c.bf16 %v1483_v61, %v1483_v61 }
 0x73a   :  { %v4078_v1 = vpop.eup %4077 }
 0x73b   :  { %v1484_v7 = vmul.f32 %v4078_v1, %v4074_v49  ;;  %3848 = vmatmul.mubr.msk.bf16.vlgmr.msra.gmra.mrb[44].mxu0 %vm1055_vm3, %v1485_v0 }
 0x73c   :  { %3858 = vmatpush3.bf16.xpose.msra.mxu0 %v1583_v4  ;;  %3859 = vmatprep.mubr.msk.bf16.mxu0 %vm4151_vm1, %v4150_v38 }
 0x73d   :  { %v1486_v8 = vpack.c.bf16 %v1484_v7, %v1484_v7  ;;  %3869 = vmatprep.subr.bf16.mxu0 %v4150_v38 }
 0x73f   :  { %3854 = vmatmul.mubr.msk.bf16.vlgmr.msra.gmra.mrb[44].mxu1 %vm1055_vm3, %v1486_v8 }
 0x740   :  { %3864 = vmatpush3.bf16.xpose.msra.mxu1 %v1627_v11  ;;  %3865 = vmatprep.mubr.msk.bf16.mxu1 %vm4151_vm1, %v4150_v38 }
 0x741   :  { %3875 = vmatprep.subr.bf16.mxu1 %v4150_v38 }
 0x743   :  { %3860 = vmatmul.mubr.bf16.vlgmr.msra.gmra.mrb[48].mxu0 %v1581_v5 }
 0x744   :  { %3870 = vmatpush3.bf16.msra.mxu0 %v4446_v56  ;;  %3871 = vmatprep.mubr.msk.bf16.mxu0 %vm4151_vm1, %v4150_v38 }
 0x745   :  { %3881 = vmatprep.subr.bf16.mxu0 %v4150_v38 }
 0x747   :  { %3866 = vmatmul.mubr.bf16.vlgmr.msra.gmra.mrb[48].mxu1 %v1625_v2 }
 0x748   :  { %3876 = vmatpush3.bf16.msra.mxu1 %v4449_v58  ;;  %3877 = vmatprep.mubr.msk.bf16.mxu1 %vm4151_vm1, %v4150_v38 }
 0x749   :  { %3887 = vmatprep.subr.bf16.mxu1 %v4150_v38 }
 0x80e   :  { %v4559_v45 = vpop.f32.mrb[44].mxu0 }
 0x80f   :  { %v3849_v10 = vpop.f32.mrb[45].mxu0 }
 0x810   :  { %v1530_v14 = vpop.f32.mrb[46].mxu0 }
 0x811   :  { %v3850_v56 = vpop.f32.mrb[47].mxu0 }
 0x812   :  { %v4561_v24 = vpop.f32.mrb[44].mxu1 }
 0x813   :  { %v1579_v50 = vpack.c.bf16 %v4561_v24, %v4559_v45  ;;  %v3855_v25 = vpop.f32.mrb[45].mxu1  ;;  %v4041_v45 = vld [vmem:[%s4948_s2 + $0x1d0] sm:$0xff]   ;;  %v4028_v24 = vld [vmem:[%s4948_s2 + $0x118] sm:$0xff]  }
 0x814   :  { %v1576_v26 = vpop.f32.mrb[46].mxu1 }
 0x815   :  { %v3856_v27 = vpop.f32.mrb[47].mxu1 }
 0x816   :  { %v1619_v46 = vpop.f32.mrb[48].mxu0 }
 0x817   :  { %v3861_v58 = vpop.f32.mrb[49].mxu0  ;;  %v1669_v44 = vsel %vm1055_vm3, %v1619_v46, -inf }
 0x818   :  { %1670 = vmax.xlane.f32.xlu0 %v1669_v44  ;;  %v1622_v28 = vpop.f32.mrb[50].mxu0 }
 0x819   :  { %v3862_v29 = vpop.f32.mrb[51].mxu0 }
 0x81a   :  { %v1663_v30 = vpop.f32.mrb[48].mxu1 }
 0x81b   :  { %v3867_v31 = vpop.f32.mrb[49].mxu1  ;;  %v1672_v32 = vsel %vm1055_vm3, %v1663_v30, -inf }
 0x81c   :  { %1673 = vmax.xlane.f32.xlu1 %v1672_v32  ;;  %v1666_v33 = vpop.f32.mrb[50].mxu1 }
 0x81d   :  { %v3868_v34 = vpop.f32.mrb[51].mxu1 }
 0x8a5   :  { %v1671_v35 = vpop.xlane.xlu0 %1670 }
 0x8a6   :  { %v1675_v36 = vsub.f32 %v1619_v46, %v1671_v35 }
 0x8a8   :  { %v1677_v37 = vmul.f32 1.442695, %v1675_v36 }
 0x8a9   :  { %v1674_v39 = vpop.xlane.xlu1 %1673 }
 0x8aa   :  { %4079 = vpow2.f32 %v1677_v37  ;;  %v1676_v41 = vsub.f32 %v1663_v30, %v1674_v39 }
 0x8ac   :  { %v1679_v23 = vmul.f32 1.442695, %v1676_v41 }
 0x8ae   :  { %4081 = vpow2.f32 %v1679_v23 }
 0x8b4   :  { %v4080_v47 = vpop.eup %4079 }
 0x8b5   :  { %v1681_v48 = vsel %vm1055_vm3, %v4080_v47, 0.0 }
 0x8b6   :  { %1682 = vadd.xlane.f32.xlu0 %v1681_v48 }
 0x8b8   :  { %v4082_v49 = vpop.eup %4081 }
 0x8b9   :  { %v1684_v52 = vsel %vm1055_vm3, %v4082_v49, 0.0 }
 0x8ba   :  { %1685 = vadd.xlane.f32.xlu1 %v1684_v52 }
 0x943   :  { %v1683_v53 = vpop.xlane.xlu0 %1682 }
 0x944   :  { %4083 = vrcp.f32 %v1683_v53 }
 0x947   :  { %v1686_v55 = vpop.xlane.xlu1 %1685 }
 0x948   :  { %4085 = vrcp.f32 %v1686_v55 }
 0x94e   :  { %v4084_v60 = vpop.eup %4083 }
 0x94f   :  { %v1689_v61 = vmul.f32 %v4084_v60, %v4080_v47 }
 0x951   :  { %v1691_v0 = vpack.c.bf16 %v1689_v61, %v1689_v61  ;;  %v1989_v61 = vrot.slane %v4415_v12, 4 }
 0x952   :  { %v4086_v1 = vpop.eup %4085 }
 0x953   :  { %v1690_v4 = vmul.f32 %v4086_v1, %v4082_v49  ;;  %3872 = vmatmul.mubr.msk.bf16.vlgmr.msra.gmra.mrb[52].mxu0 %vm1055_vm3, %v1691_v0 }
 0x954   :  { %3882 = vmatpush3.bf16.xpose.msra.mxu0 %v4415_v12  ;;  %3883 = vmatprep.mubr.msk.bf16.mxu0 %vm4151_vm1, %v4150_v38  ;;  %v1987_v12 = vrot.slane %v4395_v51, 4 }
 0x955   :  { %v1692_v7 = vpack.c.bf16 %v1690_v4, %v1690_v4  ;;  %3893 = vmatprep.subr.bf16.mxu0 %v4150_v38  ;;  %v2033_v4 = vrot.slane %v4418_v15, 4 }
 0x957   :  { %3878 = vmatmul.mubr.msk.bf16.vlgmr.msra.gmra.mrb[52].mxu1 %vm1055_vm3, %v1692_v7  ;;  %v2031_v7 = vrot.slane %v4397_v54, 4 }
 0x958   :  { %3888 = vmatpush3.bf16.xpose.msra.mxu1 %v4418_v15  ;;  %3889 = vmatprep.mubr.msk.bf16.mxu1 %vm4151_vm1, %v4150_v38 }
 0x959   :  { %3899 = vmatprep.subr.bf16.mxu1 %v4150_v38 }
 0x95b   :  { %3884 = vmatmul.mubr.bf16.vlgmr.msra.gmra.mrb[56].mxu0 %v4395_v51 }
 0x95c   :  { %3894 = vmatpush3.bf16.msra.mxu0 %v4452_v59  ;;  %3895 = vmatprep.mubr.msk.bf16.mxu0 %vm4151_vm1, %v4150_v38 }
 0x95d   :  { %3905 = vmatprep.subr.bf16.mxu0 %v4150_v38 }
 0x95f   :  { %3890 = vmatmul.mubr.bf16.vlgmr.msra.gmra.mrb[56].mxu1 %v4397_v54 }
 0x960   :  { %3900 = vmatpush3.bf16.msra.mxu1 %v4455_v3  ;;  %3901 = vmatprep.mubr.msk.bf16.mxu1 %vm4151_vm1, %v4150_v38 }
 0x961   :  { %3911 = vmatprep.subr.bf16.mxu1 %v4150_v38 }
 0xa26   :  { %v4589_v8 = vpop.f32.mrb[52].mxu0 }
 0xa27   :  { %v3873_v11 = vpop.f32.mrb[53].mxu0 }
 0xa28   :  { %v1737_v5 = vpop.f32.mrb[54].mxu0 }
 0xa29   :  { %v3874_v2 = vpop.f32.mrb[55].mxu0 }
 0xa2a   :  { %v4591_v59 = vpop.f32.mrb[52].mxu1 }
 0xa2b   :  { %v1787_v10 = vpack.c.bf16 %v4591_v59, %v4589_v8  ;;  %v3879_v14 = vpop.f32.mrb[53].mxu1  ;;  %v4002_v8 = vld [vmem:[%s4948_s2 + $0x90] sm:$0xff]   ;;  %v4003_v59 = vld [vmem:[%s4948_s2 + $0x60] sm:$0xff]  }
 0xa2c   :  { %v1784_v56 = vpop.f32.mrb[54].mxu1 }
 0xa2d   :  { %v3880_v25 = vpop.f32.mrb[55].mxu1 }
 0xa2e   :  { %v1823_v26 = vpop.f32.mrb[56].mxu0 }
 0xa2f   :  { %v3885_v3 = vpop.f32.mrb[57].mxu0  ;;  %v1869_v27 = vsel %vm1055_vm3, %v1823_v26, -inf }
 0xa30   :  { %1870 = vmax.xlane.f32.xlu0 %v1869_v27  ;;  %v1826_v46 = vpop.f32.mrb[58].mxu0 }
 0xa31   :  { %v3886_v58 = vpop.f32.mrb[59].mxu0 }
 0xa32   :  { %v1863_v44 = vpop.f32.mrb[56].mxu1 }
 0xa33   :  { %v3891_v28 = vpop.f32.mrb[57].mxu1  ;;  %v1872_v29 = vsel %vm1055_vm3, %v1863_v44, -inf }
 0xa34   :  { %1873 = vmax.xlane.f32.xlu1 %v1872_v29  ;;  %v1866_v30 = vpop.f32.mrb[58].mxu1 }
 0xa35   :  { %v3892_v31 = vpop.f32.mrb[59].mxu1 }
 0xabd   :  { %v1871_v32 = vpop.xlane.xlu0 %1870 }
 0xabe   :  { %v1875_v33 = vsub.f32 %v1823_v26, %v1871_v32 }
 0xac0   :  { %v1877_v34 = vmul.f32 1.442695, %v1875_v33 }
 0xac1   :  { %v1874_v35 = vpop.xlane.xlu1 %1873 }
 0xac2   :  { %4087 = vpow2.f32 %v1877_v34  ;;  %v1876_v36 = vsub.f32 %v1863_v44, %v1874_v35 }
 0xac4   :  { %v1879_v37 = vmul.f32 1.442695, %v1876_v36 }
 0xac6   :  { %4089 = vpow2.f32 %v1879_v37 }
 0xacc   :  { %v4088_v39 = vpop.eup %4087 }
 0xacd   :  { %v1881_v41 = vsel %vm1055_vm3, %v4088_v39, 0.0 }
 0xace   :  { %1882 = vadd.xlane.f32.xlu0 %v1881_v41 }
 0xad0   :  { %v4090_v23 = vpop.eup %4089 }
 0xad1   :  { %v1884_v47 = vsel %vm1055_vm3, %v4090_v23, 0.0 }
 0xad2   :  { %1885 = vadd.xlane.f32.xlu1 %v1884_v47 }
 0xb5b   :  { %v1883_v48 = vpop.xlane.xlu0 %1882 }
 0xb5c   :  { %4091 = vrcp.f32 %v1883_v48 }
 0xb5f   :  { %v1886_v49 = vpop.xlane.xlu1 %1885 }
 0xb60   :  { %4093 = vrcp.f32 %v1886_v49 }
 0xb66   :  { %v4092_v52 = vpop.eup %4091 }
 0xb67   :  { %v1889_v53 = vmul.f32 %v4092_v52, %v4088_v39 }
 0xb69   :  { %v1891_v55 = vpack.c.bf16 %v1889_v53, %v1889_v53 }
 0xb6a   :  { %v4094_v60 = vpop.eup %4093 }
 0xb6b   :  { %v1890_v0 = vmul.f32 %v4094_v60, %v4090_v23  ;;  %3896 = vmatmul.mubr.msk.bf16.vlgmr.msra.gmra.mrb[60].mxu0 %vm1055_vm3, %v1891_v55 }
 0xb6c   :  { %3906 = vmatpush3.bf16.xpose.msra.mxu0 %v1989_v61  ;;  %3907 = vmatprep.mubr.msk.bf16.mxu0 %vm4151_vm1, %v4150_v38 }
 0xb6d   :  { %v1892_v1 = vpack.c.bf16 %v1890_v0, %v1890_v0  ;;  %3917 = vmatprep.subr.bf16.mxu0 %v4150_v38 }
 0xb6f   :  { %3902 = vmatmul.mubr.msk.bf16.vlgmr.msra.gmra.mrb[60].mxu1 %vm1055_vm3, %v1892_v1 }
 0xb70   :  { %3912 = vmatpush3.bf16.xpose.msra.mxu1 %v2033_v4  ;;  %3913 = vmatprep.mubr.msk.bf16.mxu1 %vm4151_vm1, %v4150_v38 }
 0xb71   :  { %3923 = vmatprep.subr.bf16.mxu1 %v4150_v38 }
 0xb73   :  { %3908 = vmatmul.mubr.bf16.vlgmr.msra.gmra.mrb[64].mxu0 %v1987_v12 }
 0xb74   :  { %3918 = vmatpush3.bf16.msra.mxu0 %v4464_v17  ;;  %3919 = vmatprep.mubr.msk.bf16.mxu0 %vm4151_vm1, %v4150_v38 }
 0xb75   :  { %3929 = vmatprep.subr.bf16.mxu0 %v4150_v38 }
 0xb77   :  { %3914 = vmatmul.mubr.bf16.vlgmr.msra.gmra.mrb[64].mxu1 %v2031_v7 }
 0xb78   :  { %3924 = vmatpush3.bf16.msra.mxu1 %v4467_v19  ;;  %3925 = vmatprep.mubr.msk.bf16.mxu1 %vm4151_vm1, %v4150_v38 }
 0xb79   :  { %3935 = vmatprep.subr.bf16.mxu1 %v4150_v38 }
 0xc3e   :  { %v4619_v51 = vpop.f32.mrb[60].mxu0 }
 0xc3f   :  { %v3897_v15 = vpop.f32.mrb[61].mxu0 }
 0xc40   :  { %v1936_v11 = vpop.f32.mrb[62].mxu0 }
 0xc41   :  { %v3898_v17 = vpop.f32.mrb[63].mxu0 }
 0xc42   :  { %v4621_v5 = vpop.f32.mrb[60].mxu1 }
 0xc43   :  { %v1985_v54 = vpack.c.bf16 %v4621_v5, %v4619_v51  ;;  %v3903_v2 = vpop.f32.mrb[61].mxu1  ;;  %v4052_v51 = vld [vmem:[%s4948_s2 + $0x1b8] sm:$0xff]  }
 0xc44   :  { %v1982_v14 = vpop.f32.mrb[62].mxu1 }
 0xc45   :  { %v3904_v56 = vpop.f32.mrb[63].mxu1 }
 0xc46   :  { %v2025_v25 = vpop.f32.mrb[64].mxu0 }
 0xc47   :  { %v3909_v19 = vpop.f32.mrb[65].mxu0  ;;  %v2075_v26 = vsel %vm1055_vm3, %v2025_v25, -inf }
 0xc48   :  { %2076 = vmax.xlane.f32.xlu0 %v2075_v26  ;;  %v2028_v3 = vpop.f32.mrb[66].mxu0 }
 0xc49   :  { %v3910_v27 = vpop.f32.mrb[67].mxu0 }
 0xc4a   :  { %v2069_v46 = vpop.f32.mrb[64].mxu1 }
 0xc4b   :  { %v3915_v58 = vpop.f32.mrb[65].mxu1  ;;  %v2078_v44 = vsel %vm1055_vm3, %v2069_v46, -inf }
 0xc4c   :  { %2079 = vmax.xlane.f32.xlu1 %v2078_v44  ;;  %v2072_v28 = vpop.f32.mrb[66].mxu1 }
 0xc4d   :  { %v3916_v29 = vpop.f32.mrb[67].mxu1 }
 0xcd5   :  { %v2077_v30 = vpop.xlane.xlu0 %2076 }
 0xcd6   :  { %v2081_v31 = vsub.f32 %v2025_v25, %v2077_v30 }
 0xcd8   :  { %v2083_v32 = vmul.f32 1.442695, %v2081_v31 }
 0xcd9   :  { %v2080_v33 = vpop.xlane.xlu1 %2079 }
 0xcda   :  { %4095 = vpow2.f32 %v2083_v32  ;;  %v2082_v34 = vsub.f32 %v2069_v46, %v2080_v33 }
 0xcdc   :  { %v2085_v35 = vmul.f32 1.442695, %v2082_v34 }
 0xcde   :  { %4097 = vpow2.f32 %v2085_v35 }
 0xce4   :  { %v4096_v36 = vpop.eup %4095 }
 0xce5   :  { %v2087_v37 = vsel %vm1055_vm3, %v4096_v36, 0.0 }
 0xce6   :  { %2088 = vadd.xlane.f32.xlu0 %v2087_v37 }
 0xce8   :  { %v4098_v39 = vpop.eup %4097 }
 0xce9   :  { %v2090_v41 = vsel %vm1055_vm3, %v4098_v39, 0.0 }
 0xcea   :  { %2091 = vadd.xlane.f32.xlu1 %v2090_v41 }
 0xd73   :  { %v2089_v23 = vpop.xlane.xlu0 %2088 }
 0xd74   :  { %4099 = vrcp.f32 %v2089_v23 }
 0xd77   :  { %v2092_v47 = vpop.xlane.xlu1 %2091 }
 0xd78   :  { %4101 = vrcp.f32 %v2092_v47  ;;  %v2395_v47 = vrot.slane %v4425_v18, 4 }
 0xd7e   :  { %v4100_v48 = vpop.eup %4099 }
 0xd7f   :  { %v2095_v49 = vmul.f32 %v4100_v48, %v4096_v36 }
 0xd81   :  { %v2097_v52 = vpack.c.bf16 %v2095_v49, %v2095_v49 }
 0xd82   :  { %v4102_v53 = vpop.eup %4101 }
 0xd83   :  { %v2096_v55 = vmul.f32 %v4102_v53, %v4098_v39  ;;  %3920 = vmatmul.mubr.msk.bf16.vlgmr.msra.gmra.mrb[68].mxu0 %vm1055_vm3, %v2097_v52  ;;  %v2439_v52 = vrot.slane %v4427_v21, 4  ;;  %v2437_v53 = vrot.slane %v4401_v62, 4 }
 0xd84   :  { %3930 = vmatpush3.bf16.xpose.msra.mxu0 %v4425_v18  ;;  %3931 = vmatprep.mubr.msk.bf16.mxu0 %vm4151_vm1, %v4150_v38  ;;  %v2393_v18 = vrot.slane %v4399_v57, 4 }
 0xd85   :  { %v2098_v60 = vpack.c.bf16 %v2096_v55, %v2096_v55  ;;  %3941 = vmatprep.subr.bf16.mxu0 %v4150_v38 }
 0xd87   :  { %3926 = vmatmul.mubr.msk.bf16.vlgmr.msra.gmra.mrb[68].mxu1 %vm1055_vm3, %v2098_v60 }
 0xd88   :  { %3936 = vmatpush3.bf16.xpose.msra.mxu1 %v4427_v21  ;;  %3937 = vmatprep.mubr.msk.bf16.mxu1 %vm4151_vm1, %v4150_v38 }
 0xd89   :  { %3947 = vmatprep.subr.bf16.mxu1 %v4150_v38 }
 0xd8b   :  { %3932 = vmatmul.mubr.bf16.vlgmr.msra.gmra.mrb[72].mxu0 %v4399_v57 }
 0xd8c   :  { %3942 = vmatpush3.bf16.msra.mxu0 %v4458_v9  ;;  %3943 = vmatprep.mubr.msk.bf16.mxu0 %vm4151_vm1, %v4150_v38 }
 0xd8d   :  { %3953 = vmatprep.subr.bf16.mxu0 %v4150_v38 }
 0xd8f   :  { %3938 = vmatmul.mubr.bf16.vlgmr.msra.gmra.mrb[72].mxu1 %v4401_v62 }
 0xd90   :  { %3948 = vmatpush3.bf16.msra.mxu1 %v4461_v13  ;;  %3949 = vmatprep.mubr.msk.bf16.mxu1 %vm4151_vm1, %v4150_v38 }
 0xd91   :  { %3959 = vmatprep.subr.bf16.mxu1 %v4150_v38 }
 0xe56   :  { %v4649_v61 = vpop.f32.mrb[68].mxu0 }
 0xe57   :  { %v3921_v0 = vpop.f32.mrb[69].mxu0 }
 0xe58   :  { %v2143_v1 = vpop.f32.mrb[70].mxu0 }
 0xe59   :  { %v3922_v4 = vpop.f32.mrb[71].mxu0 }
 0xe5a   :  { %v4651_v9 = vpop.f32.mrb[68].mxu1 }
 0xe5b   :  { %v2193_v12 = vpack.c.bf16 %v4651_v9, %v4649_v61  ;;  %v3927_v7 = vpop.f32.mrb[69].mxu1  ;;  %v4040_v61 = vld [vmem:[%s4948_s2 + $0x188] sm:$0xff]   ;;  %v4027_v9 = vld [vmem:[%s4948_s2 + $0x158] sm:$0xff]  }
 0xe5c   :  { %v2190_v15 = vpop.f32.mrb[70].mxu1 }
 0xe5d   :  { %v3928_v11 = vpop.f32.mrb[71].mxu1 }
 0xe5e   :  { %v2229_v17 = vpop.f32.mrb[72].mxu0 }
 0xe5f   :  { %v3933_v13 = vpop.f32.mrb[73].mxu0  ;;  %v2275_v2 = vsel %vm1055_vm3, %v2229_v17, -inf }
 0xe60   :  { %2276 = vmax.xlane.f32.xlu0 %v2275_v2  ;;  %v2232_v14 = vpop.f32.mrb[74].mxu0 }
 0xe61   :  { %v3934_v56 = vpop.f32.mrb[75].mxu0 }
 0xe62   :  { %v2269_v25 = vpop.f32.mrb[72].mxu1 }
 0xe63   :  { %v3939_v19 = vpop.f32.mrb[73].mxu1  ;;  %v2278_v26 = vsel %vm1055_vm3, %v2269_v25, -inf }
 0xe64   :  { %2279 = vmax.xlane.f32.xlu1 %v2278_v26  ;;  %v2272_v3 = vpop.f32.mrb[74].mxu1 }
 0xe65   :  { %v3940_v27 = vpop.f32.mrb[75].mxu1 }
 0xeed   :  { %v2277_v46 = vpop.xlane.xlu0 %2276 }
 0xeee   :  { %v2281_v58 = vsub.f32 %v2229_v17, %v2277_v46 }
 0xef0   :  { %v2283_v44 = vmul.f32 1.442695, %v2281_v58 }
 0xef1   :  { %v2280_v28 = vpop.xlane.xlu1 %2279 }
 0xef2   :  { %4103 = vpow2.f32 %v2283_v44  ;;  %v2282_v29 = vsub.f32 %v2269_v25, %v2280_v28 }
 0xef4   :  { %v2285_v30 = vmul.f32 1.442695, %v2282_v29 }
 0xef6   :  { %4105 = vpow2.f32 %v2285_v30 }
 0xefc   :  { %v4104_v31 = vpop.eup %4103 }
 0xefd   :  { %v2287_v32 = vsel %vm1055_vm3, %v4104_v31, 0.0 }
 0xefe   :  { %2288 = vadd.xlane.f32.xlu0 %v2287_v32  ;;  %v3992_v32 = vld [vmem:[%s4948_s2 + $0xc0] sm:$0xff]  }
 0xf00   :  { %v4106_v33 = vpop.eup %4105 }
 0xf01   :  { %v2290_v34 = vsel %vm1055_vm3, %v4106_v33, 0.0 }
 0xf02   :  { %2291 = vadd.xlane.f32.xlu1 %v2290_v34 }
 0xf8b   :  { %v2289_v35 = vpop.xlane.xlu0 %2288 }
 0xf8c   :  { %4107 = vrcp.f32 %v2289_v35 }
 0xf8f   :  { %v2292_v36 = vpop.xlane.xlu1 %2291 }
 0xf90   :  { %4109 = vrcp.f32 %v2292_v36 }
 0xf96   :  { %v4108_v37 = vpop.eup %4107 }
 0xf97   :  { %v2295_v39 = vmul.f32 %v4108_v37, %v4104_v31  ;;  %v3989_v31 = vld [vmem:[%s4948_s2 + $0x40] sm:$0xff]  }
 0xf98   :  { %v3990_v37 = vld [vmem:[%s4948_s2] sm:$0xff]  }
 0xf99   :  { %v2297_v41 = vpack.c.bf16 %v2295_v39, %v2295_v39 }
 0xf9a   :  { %v4110_v23 = vpop.eup %4109 }
 0xf9b   :  { %v2296_v48 = vmul.f32 %v4110_v23, %v4106_v33  ;;  %3944 = vmatmul.mubr.msk.bf16.vlgmr.msra.gmra.mrb[76].mxu0 %vm1055_vm3, %v2297_v41  ;;  %v3991_v41 = vld [vmem:[%s4948_s2 + $0x48] sm:$0xff]  }
 0xf9c   :  { %3954 = vmatpush3.bf16.xpose.msra.mxu0 %v2395_v47  ;;  %3955 = vmatprep.mubr.msk.bf16.mxu0 %vm4151_vm1, %v4150_v38 }
 0xf9d   :  { %v2298_v49 = vpack.c.bf16 %v2296_v48, %v2296_v48  ;;  %3965 = vmatprep.subr.bf16.mxu0 %v4150_v38  ;;  %v3993_v48 = vld [vmem:[%s4948_s2 + $0x8] sm:$0xff]  }
 0xf9f   :  { %3950 = vmatmul.mubr.msk.bf16.vlgmr.msra.gmra.mrb[76].mxu1 %vm1055_vm3, %v2298_v49  ;;  %v3994_v49 = vld [vmem:[%s4948_s2 + $0x80] sm:$0xff]  }
 0xfa0   :  { %3960 = vmatpush3.bf16.xpose.msra.mxu1 %v2439_v52  ;;  %3961 = vmatprep.mubr.msk.bf16.mxu1 %vm4151_vm1, %v4150_v38 }
 0xfa1   :  { %3971 = vmatprep.subr.bf16.mxu1 %v4150_v38 }
 0xfa3   :  { %3956 = vmatmul.mubr.bf16.vlgmr.msra.gmra.mrb[80].mxu0 %v2393_v18  ;;  %v3995_v18 = vld [vmem:[%s4948_s2 + $0x50] sm:$0xff]  }
 0xfa4   :  { %3966 = vmatpush3.bf16.msra.mxu0 %v4470_v20  ;;  %3967 = vmatprep.mubr.msk.bf16.mxu0 %vm4151_vm1, %v4150_v38 }
 0xfa5   :  { %3694 = vmatprep.subr.bf16.mxu0 %v3989_v31  ;;  %v4044_v31 = vld [vmem:[%s4948_s2 + $0x198] sm:$0xff]  }
 0xfa7   :  { %3962 = vmatmul.mubr.bf16.vlgmr.msra.gmra.mrb[80].mxu1 %v2437_v53  ;;  %v3996_v53 = vld [vmem:[%s4948_s2 + $0xc8] sm:$0xff]  }
 0xfa8   :  { %3972 = vmatpush3.bf16.msra.mxu1 %v4473_v22  ;;  %3973 = vmatprep.mubr.msk.bf16.mxu1 %vm4151_vm1, %v4150_v38 }
 0xfa9   :  { %3716 = vmatprep.subr.bf16.mxu1 %v3992_v32  ;;  %v4031_v32 = vld [vmem:[%s4948_s2 + $0x168] sm:$0xff]  }
0x106e   :  { %v4677_v21 = vpop.f32.mrb[76].mxu0 }
0x106f   :  { %v3945_v55 = vpop.f32.mrb[77].mxu0 }
0x1070   :  { %v2342_v57 = vpop.f32.mrb[78].mxu0  ;;  %v4000_v55 = vld [vmem:[%s4948_s2 + $0xd0] sm:$0xff]  }
0x1071   :  { %v3946_v60 = vpop.f32.mrb[79].mxu0  ;;  %v4001_v57 = vld [vmem:[%s4948_s2 + $0x18] sm:$0xff]  }
0x1072   :  { %v4679_v0 = vpop.f32.mrb[76].mxu1  ;;  %v4005_v60 = vld [vmem:[%s4948_s2 + $0x20] sm:$0xff]  }
0x1073   :  { %v2391_v20 = vpack.c.bf16 %v4679_v0, %v4677_v21  ;;  %v3951_v1 = vpop.f32.mrb[77].mxu1  ;;  %v4124_v21 = vld [vmem:[%s4946_s0 + $0x8] sm:$0xff] }
0x1074   :  { %v2388_v4 = vpop.f32.mrb[78].mxu1  ;;  %v4006_v1 = vld [vmem:[%s4948_s2 + $0x98] sm:$0xff]  }
0x1075   :  { %v3952_v7 = vpop.f32.mrb[79].mxu1  ;;  %v4007_v4 = vld [vmem:[%s4948_s2 + $0x68] sm:$0xff]  }
0x1076   :  { %v2431_v62 = vpop.f32.mrb[80].mxu0  ;;  %v4008_v7 = vld [vmem:[%s4948_s2 + $0xe0] sm:$0xff]  }
0x1077   :  { %v3957_v15 = vpop.f32.mrb[81].mxu0  ;;  %v2481_v22 = vsel %vm1055_vm3, %v2431_v62, -inf }
0x1078   :  { %2482 = vmax.xlane.f32.xlu0 %v2481_v22  ;;  %v2434_v11 = vpop.f32.mrb[82].mxu0  ;;  %v4010_v15 = vld [vmem:[%s4948_s2 + $0xa0] sm:$0xff]   ;;  %v4011_v22 = vld [vmem:[%s4948_s2 + $0x70] sm:$0xff]  }
0x1079   :  { %v3958_v17 = vpop.f32.mrb[83].mxu0  ;;  %v4012_v11 = vld [vmem:[%s4948_s2 + $0xe8] sm:$0xff]  }
0x107a   :  { %v2475_v13 = vpop.f32.mrb[80].mxu1  ;;  %v4013_v17 = vld [vmem:[%s4948_s2 + $0x30] sm:$0xff]  }
0x107b   :  { %v3963_v2 = vpop.f32.mrb[81].mxu1  ;;  %v2484_v14 = vsel %vm1055_vm3, %v2475_v13, -inf }
0x107c   :  { %2485 = vmax.xlane.f32.xlu1 %v2484_v14  ;;  %v2478_v56 = vpop.f32.mrb[82].mxu1  ;;  %v4015_v2 = vld [vmem:[%s4948_s2 + $0x78] sm:$0xff]   ;;  %v4016_v14 = vld [vmem:[%s4948_s2 + $0xf0] sm:$0xff]  }
0x107d   :  { %v3964_v25 = vpop.f32.mrb[83].mxu1  ;;  %v4017_v56 = vld [vmem:[%s4948_s2 + $0x38] sm:$0xff]  }
0x107e   :  { %v4018_v25 = vld [vmem:[%s4948_s2 + $0xb0] sm:$0xff]  }
0x1105   :  { %v2483_v19 = vpop.xlane.xlu0 %2482 }
0x1106   :  { %v2487_v26 = vsub.f32 %v2431_v62, %v2483_v19  ;;  %v4009_v62 = vld [vmem:[%s4948_s2 + $0x28] sm:$0xff]   ;;  %v4019_v19 = vld [vmem:[%s4948_s2 + $0xf8] sm:$0xff]  }
0x1108   :  { %v2489_v3 = vmul.f32 1.442695, %v2487_v26  ;;  %v4020_v26 = vld [vmem:[%s4948_s2 + $0x140] sm:$0xff]  }
0x1109   :  { %v2486_v27 = vpop.xlane.xlu1 %2485 }
0x110a   :  { %4111 = vpow2.f32 %v2489_v3  ;;  %v2488_v46 = vsub.f32 %v2475_v13, %v2486_v27  ;;  %v4014_v13 = vld [vmem:[%s4948_s2 + $0xa8] sm:$0xff]   ;;  %v4021_v3 = vld [vmem:[%s4948_s2 + $0xb8] sm:$0xff]   ;;  %v4022_v27 = vld [vmem:[%s4948_s2 + $0x100] sm:$0xff]  }
0x110c   :  { %v2491_v58 = vmul.f32 1.442695, %v2488_v46  ;;  %v4023_v46 = vld [vmem:[%s4948_s2 + $0x148] sm:$0xff]  }
0x110e   :  { %4113 = vpow2.f32 %v2491_v58  ;;  %v4037_v58 = vld [vmem:[%s4948_s2 + $0x1c0] sm:$0xff]  }
0x1114   :  { %v4112_v44 = vpop.eup %4111 }
0x1115   :  { %v2493_v28 = vsel %vm1055_vm3, %v4112_v44, 0.0 }
0x1116   :  { %2494 = vadd.xlane.f32.xlu0 %v2493_v28  ;;  %v4038_v28 = vld [vmem:[%s4948_s2 + $0x180] sm:$0xff]  }
0x1118   :  { %v4114_v29 = vpop.eup %4113 }
0x1119   :  { %v2496_v30 = vsel %vm1055_vm3, %v4114_v29, 0.0 }
0x111a   :  { %2497 = vadd.xlane.f32.xlu1 %v2496_v30  ;;  %v4030_v30 = vld [vmem:[%s4948_s2 + $0x120] sm:$0xff]  }
0x11a3   :  { %v2495_v33 = vpop.xlane.xlu0 %2494 }
0x11a4   :  { %4115 = vrcp.f32 %v2495_v33  ;;  %v4045_v33 = vld [vmem:[%s4948_s2 + $0x1e0] sm:$0xff]  }
0x11a7   :  { %v2498_v34 = vpop.xlane.xlu1 %2497 }
0x11a8   :  { %4117 = vrcp.f32 %v2498_v34  ;;  %v4032_v34 = vld [vmem:[%s4948_s2 + $0x128] sm:$0xff]  }
0x11ae   :  { %v4116_v35 = vpop.eup %4115 }
0x11af   :  { %v2501_v36 = vmul.f32 %v4116_v35, %v4112_v44  ;;  %v4024_v44 = vld [vmem:[%s4948_s2 + $0x108] sm:$0xff]   ;;  %v4046_v35 = vld [vmem:[%s4948_s2 + $0x1a0] sm:$0xff]  }
0x11b1   :  { %v2503_v39 = vpack.c.bf16 %v2501_v36, %v2501_v36  ;;  %v4033_v36 = vld [vmem:[%s4948_s2 + $0x170] sm:$0xff]  }
0x11b2   :  { %v4118_v23 = vpop.eup %4117 }
0x11b3   :  { %v2502_v47 = vmul.f32 %v4118_v23, %v4114_v29  ;;  %3968 = vmatmul.mubr.msk.bf16.vlgmr.msra.gmra.mrb[84].mxu0 %vm1055_vm3, %v2503_v39  ;;  %v4043_v29 = vld [vmem:[%s4948_s2 + $0x1d8] sm:$0xff]   ;;  %v4034_v39 = vld [vmem:[%s4948_s2 + $0x130] sm:$0xff]  }
0x11b4   :  { %3695 = vmatpush3.bf16.msra.mxu0 %v3990_v37  ;;  %3153 = vmatprep.mubr.bf16.mxu0 %v1381_v42  ;;  %v3999_v42 = vld [vmem:[%s4948_s2 + $0x58] sm:$0xff]   ;;  %v4047_v37 = vld [vmem:[%s4948_s2 + $0x1e8] sm:$0xff]  }
0x11b5   :  { %3696 = vmatprep.subr.bf16.mxu0 %v3991_v41  ;;  %v2504_v52 = vpack.c.bf16 %v2502_v47, %v2502_v47  ;;  %v4048_v41 = vld [vmem:[%s4948_s2 + $0x1a8] sm:$0xff]   ;;  %v4035_v23 = vld [vmem:[%s4948_s2 + $0x178] sm:$0xff]  }
0x11b6   :  { %v4036_v47 = vld [vmem:[%s4948_s2 + $0x138] sm:$0xff]  }
0x11b7   :  { %3974 = vmatmul.mubr.msk.bf16.vlgmr.msra.gmra.mrb[84].mxu1 %vm1055_vm3, %v2504_v52  ;;  %v4051_v52 = vld [vmem:[%s4948_s2 + $0x1f8] sm:$0xff]  }
0x11b8   :  { %3697 = vmatpush3.bf16.msra.mxu0 %v3993_v48  ;;  %3717 = vmatpush3.bf16.msra.mxu1 %v3994_v49  ;;  %v4049_v48 = vld [vmem:[%s4948_s2 + $0x1f0] sm:$0xff]  }
0x11b9   :  { %3194 = vmatprep.mubr.bf16.mxu1 %v1787_v10  ;;  %3698 = vmatprep.subr.bf16.mxu0 %v3995_v18  ;;  %v4004_v10 = vld [vmem:[%s4948_s2 + $0xd8] sm:$0xff]   ;;  %v4050_v49 = vld [vmem:[%s4948_s2 + $0x1b0] sm:$0xff]  }
0x11ba   :  { %3718 = vmatprep.subr.bf16.mxu1 %v3996_v53 }
0x11bc   :  { %3699 = vmatpush3.bf16.msra.mxu0 %v3997_v63  ;;  %3719 = vmatpush3.bf16.msra.mxu1 %v3998_v6 }
0x11bd   :  { %3700 = vmatprep.subr.bf16.mxu0 %v3999_v42  ;;  %3720 = vmatprep.subr.bf16.mxu1 %v4000_v55 }
0x11c0   :  { %3701 = vmatpush3.bf16.msra.mxu0 %v4001_v57  ;;  %3721 = vmatpush3.bf16.msra.mxu1 %v4002_v8 }
0x11c1   :  { %3702 = vmatprep.subr.bf16.mxu0 %v4003_v59  ;;  %3722 = vmatprep.subr.bf16.mxu1 %v4004_v10 }
0x11c4   :  { %3703 = vmatpush3.bf16.msra.mxu0 %v4005_v60  ;;  %3723 = vmatpush3.bf16.msra.mxu1 %v4006_v1 }
0x11c5   :  { %3704 = vmatprep.subr.bf16.mxu0 %v4007_v4  ;;  %3724 = vmatprep.subr.bf16.mxu1 %v4008_v7 }
0x11c8   :  { %3705 = vmatpush3.bf16.msra.mxu0 %v4009_v62  ;;  %3725 = vmatpush3.bf16.msra.mxu1 %v4010_v15  ;;  %v4123_v15 = vld [vmem:[%s4946_s0] sm:$0xff] }
0x11c9   :  { %3706 = vmatprep.subr.bf16.mxu0 %v4011_v22  ;;  %3726 = vmatprep.subr.bf16.mxu1 %v4012_v11 }
0x11cc   :  { %3707 = vmatpush3.bf16.msra.mxu0 %v4013_v17  ;;  %3727 = vmatpush3.bf16.msra.mxu1 %v4014_v13 }
0x11cd   :  { %3708 = vmatprep.subr.bf16.mxu0 %v4015_v2  ;;  %3728 = vmatprep.subr.bf16.mxu1 %v4016_v14 }
0x11d0   :  { %3709 = vmatpush3.bf16.msra.mxu0 %v4017_v56  ;;  %3729 = vmatpush3.bf16.msra.mxu1 %v4018_v25 }
0x11d1   :  { %3730 = vmatprep.subr.bf16.mxu1 %v4019_v19  ;;  %3738 = vmatprep.subr.bf16.mxu0 %v4020_v26 }
0x11d3   :  { %3154 = vmatmul.mubr.bf16.vlgmr.msra.gmra.mrb[88].mxu0 %v1173_v43  ;;  %v4026_v43 = vld [vmem:[%s4948_s2 + $0x110] sm:$0xff]  }
0x11d4   :  { %3731 = vmatpush3.bf16.msra.mxu1 %v4021_v3  ;;  %3739 = vmatpush3.bf16.msra.mxu0 %v4022_v27 }
0x11d5   :  { %3235 = vmatprep.mubr.bf16.mxu0 %v2193_v12  ;;  %3740 = vmatprep.subr.bf16.mxu0 %v4023_v46  ;;  %v4029_v12 = vld [vmem:[%s4948_s2 + $0x160] sm:$0xff]  }
0x11d6   :  { %3760 = vmatprep.subr.bf16.mxu1 %v4037_v58 }
0x11d7   :  { %3195 = vmatmul.mubr.bf16.vlgmr.msra.gmra.mrb[88].mxu1 %v1579_v50  ;;  %v4042_v50 = vld [vmem:[%s4948_s2 + $0x190] sm:$0xff]  }
0x11d8   :  { %3741 = vmatpush3.bf16.msra.mxu0 %v4024_v44  ;;  %3761 = vmatpush3.bf16.msra.mxu1 %v4038_v28 }
0x11d9   :  { %3742 = vmatprep.subr.bf16.mxu0 %v4025_v40  ;;  %3762 = vmatprep.subr.bf16.mxu1 %v4039_v16 }
0x11dc   :  { %3743 = vmatpush3.bf16.msra.mxu0 %v4026_v43  ;;  %3763 = vmatpush3.bf16.msra.mxu1 %v4040_v61 }
0x11dd   :  { %3744 = vmatprep.subr.bf16.mxu0 %v4027_v9  ;;  %3764 = vmatprep.subr.bf16.mxu1 %v4041_v45 }
0x11e0   :  { %3745 = vmatpush3.bf16.msra.mxu0 %v4028_v24  ;;  %3765 = vmatpush3.bf16.msra.mxu1 %v4042_v50 }
0x11e1   :  { %3746 = vmatprep.subr.bf16.mxu0 %v4029_v12  ;;  %3766 = vmatprep.subr.bf16.mxu1 %v4043_v29 }
0x11e4   :  { %3747 = vmatpush3.bf16.msra.mxu0 %v4030_v30  ;;  %3767 = vmatpush3.bf16.msra.mxu1 %v4044_v31 }
0x11e5   :  { %3748 = vmatprep.subr.bf16.mxu0 %v4031_v32  ;;  %3768 = vmatprep.subr.bf16.mxu1 %v4045_v33 }
0x11e8   :  { %3749 = vmatpush3.bf16.msra.mxu0 %v4032_v34  ;;  %3769 = vmatpush3.bf16.msra.mxu1 %v4046_v35 }
0x11e9   :  { %3750 = vmatprep.subr.bf16.mxu0 %v4033_v36  ;;  %3770 = vmatprep.subr.bf16.mxu1 %v4047_v37 }
0x11ec   :  { %3751 = vmatpush3.bf16.msra.mxu0 %v4034_v39  ;;  %3771 = vmatpush3.bf16.msra.mxu1 %v4048_v41  ;;  %v4053_v39 = vld [vmem:[%s4951_s5] sm:$0xff]   ;;  %v4054_v41 = vld [vmem:[%s4951_s5 + $0x8] sm:$0xff]  }
0x11ed   :  { %3752 = vmatprep.subr.bf16.mxu0 %v4035_v23  ;;  %3772 = vmatprep.subr.bf16.mxu1 %v4049_v48 }
0x11f0   :  { %3753 = vmatpush3.bf16.msra.mxu0 %v4036_v47  ;;  %3773 = vmatpush3.bf16.msra.mxu1 %v4050_v49 }
0x11f1   :  { %3977 = vmatprep.subr.bf16.mxu0 %v4150_v38  ;;  %3774 = vmatprep.subr.bf16.mxu1 %v4051_v52 }
0x11f3   :  { %3236 = vmatmul.mubr.bf16.vlgmr.msra.gmra.mrb[92].mxu0 %v1985_v54 }
0x11f4   :  { %3981 = vmatprep.mubr.msk.bf16.mxu0 %vm4151_vm1, %v4150_v38  ;;  %3775 = vmatpush3.bf16.msra.mxu1 %v4052_v51 }
0x11f5   :  { %3978 = vmatpush3.bf16.msra.mxu0 %v4053_v39 }
0x11f6   :  { %3979 = vmatprep.subr.bf16.mxu0 %v4150_v38  ;;  %v3601_v38 = vld [vmem:[%s4950_s4] ss:$0 sm:$0xff] }
0x11f9   :  { %3980 = vmatpush3.bf16.msra.mxu0 %v4054_v41 }
0x1286   :  { %v2546_v5 = vpop.f32.mrb[84].mxu0 }
0x1287   :  { %v3969_v54 = vpop.f32.mrb[85].mxu0 }
0x1288   :  { %v2549_v18 = vpop.f32.mrb[86].mxu0  ;;  %v3600_v54 = vld [vmem:[%s4949_s3] ss:$0 sm:$0xff] }
0x1289   :  { %v3970_v53 = vpop.f32.mrb[87].mxu0 }
0x128a   :  { %v2593_v63 = vpop.f32.mrb[84].mxu1 }
0x128b   :  { %v2599_v6 = vpack.c.bf16 %v2593_v63, %v2546_v5  ;;  %v3975_v42 = vpop.f32.mrb[85].mxu1 }
0x128c   :  { %v2596_v55 = vpop.f32.mrb[86].mxu1 }
0x128d   :  { %v3976_v57 = vpop.f32.mrb[87].mxu1  ;;  %3276 = vmatprep.mubr.bf16.mxu1 %v2599_v6 }
0x128e   :  { %3277 = vmatmul.mubr.bf16.vlgmr.msra.gmra.mrb[92].mxu1 %v2391_v20 }
0x12a6   :  { %v3710_v8 = vpop.f32.mrb[88].mxu0 }
0x12a7   :  { %v3711_v59 = vpop.f32.mrb[89].mxu0 }
0x12a8   :  { %v3712_v10 = vadd.f32 %v3711_v59, %v3710_v8  ;;  %v3713_v60 = vpop.f32.mrb[90].mxu0 }
0x12a9   :  { %v3714_v1 = vpop.f32.mrb[91].mxu0 }
0x12aa   :  { %v3715_v4 = vadd.f32 %v3714_v1, %v3713_v60  ;;  %v3732_v7 = vpop.f32.mrb[88].mxu1  ;;  %v3156_v22 = vadd.f32 %v4123_v15, %v3712_v10 }
0x12ab   :  { %v3733_v62 = vpop.f32.mrb[89].mxu1 }
0x12ac   :  { %v3734_v11 = vadd.f32 %v3733_v62, %v3732_v7  ;;  %v3735_v17 = vpop.f32.mrb[90].mxu1  ;;  %v3159_v0 = vadd.f32 %v4124_v21, %v3715_v4 }
0x12ad   :  { %v3736_v13 = vpop.f32.mrb[91].mxu1 }
0x12ae   :  { %v3197_v20 = vadd.f32 %v3734_v11, %v3156_v22  ;;  %v3737_v2 = vadd.f32 %v3736_v13, %v3735_v17 }
0x12b0   :  { %v3200_v14 = vadd.f32 %v3737_v2, %v3159_v0 }
0x12c6   :  { %v3754_v56 = vpop.f32.mrb[92].mxu0 }
0x12c7   :  { %v3755_v25 = vpop.f32.mrb[93].mxu0 }
0x12c8   :  { %v3756_v19 = vadd.f32 %v3755_v25, %v3754_v56  ;;  %v3757_v26 = vpop.f32.mrb[94].mxu0 }
0x12c9   :  { %v3758_v3 = vpop.f32.mrb[95].mxu0 }
0x12ca   :  { %v3238_v27 = vadd.f32 %v3756_v19, %v3197_v20  ;;  %v3759_v46 = vadd.f32 %v3758_v3, %v3757_v26  ;;  %v3602_v3 = vld [vmem:[%s4952_s6] ss:$0 sm:$0xff] }
0x12cc   :  { %v3241_v58 = vadd.f32 %v3759_v46, %v3200_v14 }
0x1361   :  { %v3776_v44 = vpop.f32.mrb[92].mxu1 }
0x1362   :  { %v3777_v28 = vpop.f32.mrb[93].mxu1 }
0x1363   :  { %v3778_v40 = vadd.f32 %v3777_v28, %v3776_v44  ;;  %v3779_v16 = vpop.f32.mrb[94].mxu1 }
0x1364   :  { %v3780_v43 = vpop.f32.mrb[95].mxu1 }
0x1365   :  { %v3781_v61 = vadd.f32 %v3780_v43, %v3779_v16  ;;  %v3279_v9 = vadd.f32 %v3778_v40, %v3238_v27 }
0x1367   :  { %v3285_v45 = vsel %vm319_vm0, %v3279_v9, 0.0  ;;  %v3282_v24 = vadd.f32 %v3781_v61, %v3241_v58 }
0x1368   :  { %3286 = vadd.xlane.f32.xlu0 %v3285_v45 }
0x1369   :  { %v3288_v50 = vsel %vm319_vm0, %v3282_v24, 0.0 }
0x136a   :  { %3289 = vadd.xlane.f32.xlu1 %v3288_v50 }
0x13f5   :  { %v3287_v12 = vpop.xlane.xlu0 %3286 }
0x13f6   :  { %v3292_v29 = vmul.f32 0.03125, %v3287_v12 }
0x13f7   :  { %v3290_v30 = vpop.xlane.xlu1 %3289 }
0x13f8   :  { %v3294_v31 = vsub.f32 %v3279_v9, %v3292_v29  ;;  %v3293_v32 = vmul.f32 0.03125, %v3290_v30 }
0x13fa   :  { %v3295_v33 = vsub.f32 %v3282_v24, %v3293_v32  ;;  %v3296_v34 = vmul.f32 %v3294_v31, %v3294_v31 }
0x13fc   :  { %v3298_v35 = vsel %vm319_vm0, %v3296_v34, 0.0  ;;  %v3297_v36 = vmul.f32 %v3295_v33, %v3295_v33 }
0x13fd   :  { %3299 = vadd.xlane.f32.xlu0 %v3298_v35 }
0x13fe   :  { %v3301_v37 = vsel %vm319_vm0, %v3297_v36, 0.0 }
0x13ff   :  { %3302 = vadd.xlane.f32.xlu1 %v3301_v37 }
0x148a   :  { %v3300_v23 = vpop.xlane.xlu0 %3299 }
0x148b   :  { %v3304_v47 = vmul.f32 0.03125, %v3300_v23 }
0x148c   :  { %v3303_v48 = vpop.xlane.xlu1 %3302 }
0x148d   :  { %v3306_v49 = vadd.f32 1e-06, %v3304_v47  ;;  %v3305_v52 = vmul.f32 0.03125, %v3303_v48 }
0x148f   :  { %4119 = vrsqrt.f32 %v3306_v49  ;;  %v3307_v51 = vadd.f32 1e-06, %v3305_v52 }
0x1491   :  { %4121 = vrsqrt.f32 %v3307_v51 }
0x1499   :  { %v4120_v5 = vpop.eup %4119 }
0x149a   :  { %v3310_v18 = vmul.f32 %v4120_v5, %v3294_v31 }
0x149b   :  { %v4122_v53 = vpop.eup %4121 }
0x149c   :  { %v3319_v63 = vmul.f32 %v3600_v54, %v3310_v18  ;;  %v3311_v6 = vmul.f32 %v4122_v53, %v3295_v33 }
0x149e   :  { %v3328_v42 = vadd.f32 %v3601_v38, %v3319_v63  ;;  %v3320_v55 = vmul.f32 %v3600_v54, %v3311_v6 }
0x14a0   :  { %v3330_v57 = vsel %vm319_vm0, %v3328_v42, 0.0  ;;  %v3329_v8 = vadd.f32 %v3601_v38, %v3320_v55 }
0x14a1   :  { %v3331_v59 = vrot.slane %v3330_v57, 4 }
0x14a2   :  { %v3337_v10 = vsel %vm319_vm0, %v3329_v8, 0.0 }
0x14a3   :  { %v3332_v60 = vadd.f32 %v3331_v59, %v3330_v57  ;;  %v3338_v1 = vrot.slane %v3337_v10, 4 }
0x14a5   :  { %v3333_v4 = vrot.slane %v3332_v60, 2  ;;  %v3339_v7 = vadd.f32 %v3338_v1, %v3337_v10 }
0x14a7   :  { %v3340_v62 = vrot.slane %v3339_v7, 2  ;;  %v3334_v15 = vadd.f32 %v3333_v4, %v3332_v60 }
0x14a9   :  { %v3335_v22 = vrot.slane %v3334_v15, 1  ;;  %v3341_v11 = vadd.f32 %v3340_v62, %v3339_v7 }
0x14ab   :  { %v3336_v17 = vadd.f32 %v3335_v22, %v3334_v15  ;;  %v3342_v13 = vrot.slane %v3341_v11, 1 }
0x14ad   :  { %v3343_v21 = vadd.f32 %v3342_v13, %v3341_v11  ;;  %v3344_v0 = vmax.f32 %v3336_v17, 0.0 }
0x14af   :  { %v3345_v20 = vmax.f32 %v3343_v21, 0.0  ;;  %v3346_v2 = vpack.c.bf16 %v3344_v0, %v3344_v0 }
0x14b1   :  { %v3347_v14 = vpack.c.bf16 %v3345_v20, %v3345_v20  ;;  %v3361_v56 = vunpack.c.l.b16 %v3346_v2 }
0x14b3   :  { %v3362_v25 = vunpack.c.l.b16 %v3347_v14 }
0x14b5   :  { %v3364_v19 = vsel %vm3363_vm4, %v3362_v25, %v3361_v56 }
0x14b6   :  { %v3365_v26 = vpack.c.b16 %v3364_v19, %v3364_v19 }
0x14b8   :  { %3982 = vmatmul.mubr.msk.bf16.vlgmr.msra.gmra.mrb[96].mxu0 %vm319_vm0, %v3365_v26 }
0x158b   :  { %v3415_v27 = vpop.f32.mrb[96].mxu0 }
0x158c   :  { %v3416_v46 = vadd.f32 %v3602_v3, %v3415_v27  ;;  %v3983_v58 = vpop.f32.mrb[97].mxu0 }
0x158d   :  { %v3418_v44 = vpop.f32.mrb[98].mxu0 }
0x158e   :  { %3421 = vst [vmem:[#allocation3] sm:$0x3] %v3416_v46  ;;  %v3984_v28 = vpop.f32.mrb[99].mxu0 }
0x158f   :  { %4136 = shalt.err (!%p4133_p4)
}
0x1590   :  { %s4137_s6 = scalar_lea.hbm %s4953_s7, 32 }
0x1591   :  { %p4138_p5 = scmp.ne.s32.totalorder %s4953_s7, %s4137_s6  ;;  %p4141_p6 = scmp.lt.u32.totalorder %s4137_s6, %s4953_s7 }
0x1593   :  { %p4143_p7 = pnand %p4141_p6, %p4138_p5 }
0x1595   :  { %4146 = shalt.err (!%p4143_p7)
}
0x1596   :  { %3431 = dma.vmem_to_hbm [thread:$0]  %s3429_s26, 32, %s4953_s7, [#allocation4]  }
0x1597   :  { %4147 = dma.done.wait [#allocation4], 32  }
0x1598   :  { %4148 = vsyncadd [#allocation4], 4294967264 }
0x1599   :  { %3435 = vsyncpa [#allocation4], 1 }

</bundles_post_ra>
